<compile_context>
chip_gen: v5e
topology: v5e:2x2
jax: 0.10.0
libtpu: 0.0.40
codegen_flags: <defaults>
</compile_context>

<pallas_src>
import jax
import jax.numpy as jnp
from jax.experimental import pallas as pl
from jax.experimental.pallas import tpu as pltpu  # noqa: F401  (kept for TPU-specific tuning hooks)

# ----------------------------- config ---------------------------------------
WORD_VOCAB = 50
CHAR_VOCAB = 40
WORD_DIM   = 32    # word_vocab.vectors.size()[1]
CHAR_DIM   = 30    # CharEmbedding default embedding_dim=30
CHAR_HID   = 32    # CharLstmEmbedding hidden size (char embedding_dim contribution)
CTX_DIM    = 16    # ctx_dim > 0 branch
N_TOKENS   = 16    # total packed tokens
MAX_CHARS  = 8     # chars per token
DROPOUT_P  = 0.5

# Padded sizes for clean (8,128) tiling / lane-dense stores.
WORD_VOCAB_PAD = 128
CHAR_VOCAB_PAD = 128
CHAR_DIM_PAD   = 32
D_OUT          = WORD_DIM + CHAR_HID + CTX_DIM   # 80 (logical output width)
D_PAD          = 128                             # lane-dense padded output width


# --------------------------- fused kernel ------------------------------------
def _embedding_layer_kernel(word_ids_ref, char_ids_ref, word_tab_ref, char_tab_ref,
                            w_ih_ref, w_hh_ref, b_ref, ctx_ref, mask_ref, out_ref):
    n = word_ids_ref.shape[0]                 # tokens
    t = char_ids_ref.shape[0] // n            # chars per token (ids are time-major flat)
    hdim = w_hh_ref.shape[0]

    # 1) word embedding: one-hot x table on the MXU (table is VMEM-resident)
    wv = word_tab_ref.shape[0]
    w_onehot = (jax.lax.broadcasted_iota(jnp.int32, (n, wv), 1)
                == word_ids_ref[...]).astype(jnp.float32)              # [N, Vw_pad]
    word_e = jnp.dot(w_onehot, word_tab_ref[...],
                     preferred_element_type=jnp.float32)               # [N, Dw]

    # 2) char embedding gather as one big one-hot matmul (time-major rows: s*N + token)
    cv = char_tab_ref.shape[0]
    c_onehot = (jax.lax.broadcasted_iota(jnp.int32, (n * t, cv), 1)
                == char_ids_ref[...]).astype(jnp.float32)              # [T*N, Vc_pad]
    char_vecs = jnp.dot(c_onehot, char_tab_ref[...],
                        preferred_element_type=jnp.float32)            # [T*N, Dc_pad]

    # 3) char LSTM: input projection hoisted out of the recurrence; recurrence unrolled.
    xproj = jnp.dot(char_vecs, w_ih_ref[...],
                    preferred_element_type=jnp.float32) + b_ref[...]   # [T*N, 4H]
    h = jnp.zeros((n, hdim), jnp.float32)
    c = jnp.zeros((n, hdim), jnp.float32)
    for s in range(t):                      # static unroll; timestep s = contiguous rows
        gates = xproj[s * n:(s + 1) * n, :] + jnp.dot(
            h, w_hh_ref[...], preferred_element_type=jnp.float32)      # [N, 4H]
        i_g = jax.nn.sigmoid(gates[:, 0 * hdim:1 * hdim])
        f_g = jax.nn.sigmoid(gates[:, 1 * hdim:2 * hdim])
        g_g = jnp.tanh(gates[:, 2 * hdim:3 * hdim])
        o_g = jax.nn.sigmoid(gates[:, 3 * hdim:4 * hdim])
        c = f_g * c + i_g * g_g
        h = o_g * jnp.tanh(c)

    # 4) concat(word, char_lstm, ctx), padded to a lane-dense 128-wide slab, + dropout.
    d_pad = out_ref.shape[1]
    d_used = word_e.shape[1] + hdim + ctx_ref.shape[1]
    data = jnp.concatenate(
        [word_e, h, ctx_ref[...], jnp.zeros((n, d_pad - d_used), jnp.float32)],
        axis=-1)                                                       # [N, D_PAD]
    out_ref[...] = data * mask_ref[...]


# ----------------------------- wrappers --------------------------------------
def make_dropout_mask(key, n, p=DROPOUT_P, train=True):
    """Pre-scaled dropout keep-mask [n, D_PAD] (host-side PRNG; see TODO above)."""
    if not train or p <= 0.0:
        return jnp.ones((n, D_PAD), jnp.float32)
    keep = jax.random.bernoulli(key, 1.0 - p, (n, D_PAD)).astype(jnp.float32)
    return keep * (1.0 / (1.0 - p))


def embedding_layer_forward(params, word_ids, char_ids, ctx, dropout_mask):
    """Fused EmbeddingLayer forward: [N] word ids, [N,T] char ids, [N,Dctx] ctx -> [N, D_OUT]."""
    n, t = char_ids.shape

    # Zero-pad tables/weights to lane-/sublane-friendly shapes (padding is exact).
    word_tab = jnp.zeros((WORD_VOCAB_PAD, WORD_DIM), jnp.float32)
    word_tab = word_tab.at[:WORD_VOCAB, :].set(params["word_table"])
    char_tab = jnp.zeros((CHAR_VOCAB_PAD, CHAR_DIM_PAD), jnp.float32)
    char_tab = char_tab.at[:CHAR_VOCAB, :CHAR_DIM].set(params["char_table"])
    w_ih = jnp.zeros((CHAR_DIM_PAD, 4 * CHAR_HID), jnp.float32)
    w_ih = w_ih.at[:CHAR_DIM, :].set(params["w_ih"])

    word_ids2d = word_ids.reshape(n, 1).astype(jnp.int32)
    # Time-major flat char ids: row = s * n + token -> contiguous sublanes per timestep.
    char_ids_tm = char_ids.astype(jnp.int32).T.reshape(n * t, 1)

    # Single fused pallas_call: no grid, every operand is a whole-array VMEM block.
    out_pad = pl.pallas_call(
        _embedding_layer_kernel,
        out_shape=jax.ShapeDtypeStruct((n, D_PAD), jnp.float32),
    )(word_ids2d, char_ids_tm, word_tab, char_tab, w_ih,
      params["w_hh"], params["b"], ctx, dropout_mask)

    return out_pad[:, :D_OUT]


# ----------------------- pure-JAX reference (for checking) -------------------
def reference_forward(params, word_ids, char_ids, ctx, dropout_mask):
    word_e = params["word_table"][word_ids]                       # [N, Dw]
    cvec = params["char_table"][char_ids]                         # [N, T, Dc]
    n, t, _ = cvec.shape
    h = jnp.zeros((n, CHAR_HID), jnp.float32)
    c = jnp.zeros((n, CHAR_HID), jnp.float32)
    for s in range(t):
        gates = cvec[:, s, :] @ params["w_ih"] + h @ params["w_hh"] + params["b"]
        i_g = jax.nn.sigmoid(gates[:, 0 * CHAR_HID:1 * CHAR_HID])
        f_g = jax.nn.sigmoid(gates[:, 1 * CHAR_HID:2 * CHAR_HID])
        g_g = jnp.tanh(gates[:, 2 * CHAR_HID:3 * CHAR_HID])
        o_g = jax.nn.sigmoid(gates[:, 3 * CHAR_HID:4 * CHAR_HID])
        c = f_g * c + i_g * g_g
        h = o_g * jnp.tanh(c)
    data = jnp.concatenate([word_e, h, ctx], axis=-1)
    return data * dropout_mask[:, :D_OUT]


def init_params(key):
    ks = jax.random.split(key, 5)
    return {
        "word_table": jax.random.normal(ks[0], (WORD_VOCAB, WORD_DIM), jnp.float32) * 0.1,
        "char_table": jax.random.normal(ks[1], (CHAR_VOCAB, CHAR_DIM), jnp.float32) * 0.1,
        "w_ih": jax.random.normal(ks[2], (CHAR_DIM, 4 * CHAR_HID), jnp.float32) * 0.1,
        "w_hh": jax.random.normal(ks[3], (CHAR_HID, 4 * CHAR_HID), jnp.float32) * 0.1,
        "b": jax.random.normal(ks[4], (1, 4 * CHAR_HID), jnp.float32) * 0.1,
    }


if __name__ == "__main__":
    key = jax.random.PRNGKey(0)
    k_par, k_word, k_char, k_ctx, k_drop = jax.random.split(key, 5)

    params = init_params(k_par)
    word_ids = jax.random.randint(k_word, (N_TOKENS,), 0, WORD_VOCAB, jnp.int32)
    char_ids = jax.random.randint(k_char, (N_TOKENS, MAX_CHARS), 0, CHAR_VOCAB, jnp.int32)
    ctx = jax.random.normal(k_ctx, (N_TOKENS, CTX_DIM), jnp.float32)
    mask = make_dropout_mask(k_drop, N_TOKENS, DROPOUT_P, train=True)

    out = embedding_layer_forward(params, word_ids, char_ids, ctx, mask)
    out = jax.block_until_ready(out)

    expected_dim = CTX_DIM + WORD_DIM + CHAR_HID
    assert out.shape == (N_TOKENS, expected_dim), out.shape
    assert out.dtype == jnp.float32

    ref = reference_forward(params, word_ids, char_ids, ctx, mask)
    max_err = float(jnp.max(jnp.abs(out - ref)))
    assert max_err < 1e-2, f"kernel vs reference mismatch: max abs err = {max_err}"

    print("KERNEL_OK")
</pallas_src>

<mosaic_0001>
module attributes {stable_mosaic.version = 11 : i64} {
  func.func @_embedding_layer_kernel(%arg0: memref<16x1xi32, #tpu.memory_space<vmem>>, %arg1: memref<128x1xi32, #tpu.memory_space<vmem>>, %arg2: memref<128x32xf32, #tpu.memory_space<vmem>>, %arg3: memref<128x32xf32, #tpu.memory_space<vmem>>, %arg4: memref<32x128xf32, #tpu.memory_space<vmem>>, %arg5: memref<32x128xf32, #tpu.memory_space<vmem>>, %arg6: memref<1x128xf32, #tpu.memory_space<vmem>>, %arg7: memref<16x16xf32, #tpu.memory_space<vmem>>, %arg8: memref<16x128xf32, #tpu.memory_space<vmem>>, %arg9: memref<16x128xf32, #tpu.memory_space<vmem>>) attributes {dimension_semantics = [], scalar_prefetch = 0 : i64, scratch_operands = 0 : i64, tpu.core_type = #tpu.core_type<tc>} {
    %0 = tpu.iota {dimensions = array<i32: 1>} : vector<16x128xi32>
    %c0 = arith.constant 0 : index
    %c0_0 = arith.constant 0 : index
    %1 = vector.load %arg0[%c0, %c0_0] : memref<16x1xi32, #tpu.memory_space<vmem>>, vector<16x1xi32>
    %2 = vector.broadcast %1 : vector<16x1xi32> to vector<16x128xi32>
    %3 = arith.cmpi eq, %0, %2 : vector<16x128xi32>
    %4 = arith.extui %3 : vector<16x128xi1> to vector<16x128xi32>
    %5 = arith.sitofp %4 : vector<16x128xi32> to vector<16x128xf32>
    %c0_1 = arith.constant 0 : index
    %c0_2 = arith.constant 0 : index
    %6 = vector.load %arg2[%c0_1, %c0_2] : memref<128x32xf32, #tpu.memory_space<vmem>>, vector<128x32xf32>
    %cst = arith.constant dense<0.000000e+00> : vector<16x32xf32>
    %7 = tpu.matmul %5, %6, %cst {dimension_numbers = #tpu.dot_dimension_numbers<[1], [0], [0], [1], [0, 0, 1, 1], [], []>} : vector<16x128xf32>, vector<128x32xf32>, vector<16x32xf32> -> vector<16x32xf32>
    %8 = tpu.iota {dimensions = array<i32: 1>} : vector<128x128xi32>
    %c0_3 = arith.constant 0 : index
    %c0_4 = arith.constant 0 : index
    %9 = vector.load %arg1[%c0_3, %c0_4] : memref<128x1xi32, #tpu.memory_space<vmem>>, vector<128x1xi32>
    %10 = vector.broadcast %9 : vector<128x1xi32> to vector<128x128xi32>
    %11 = arith.cmpi eq, %8, %10 : vector<128x128xi32>
    %12 = arith.extui %11 : vector<128x128xi1> to vector<128x128xi32>
    %13 = arith.sitofp %12 : vector<128x128xi32> to vector<128x128xf32>
    %c0_5 = arith.constant 0 : index
    %c0_6 = arith.constant 0 : index
    %14 = vector.load %arg3[%c0_5, %c0_6] : memref<128x32xf32, #tpu.memory_space<vmem>>, vector<128x32xf32>
    %cst_7 = arith.constant dense<0.000000e+00> : vector<128x32xf32>
    %15 = tpu.matmul %13, %14, %cst_7 {dimension_numbers = #tpu.dot_dimension_numbers<[1], [0], [0], [1], [0, 0, 1, 1], [], []>} : vector<128x128xf32>, vector<128x32xf32>, vector<128x32xf32> -> vector<128x32xf32>
    %c0_8 = arith.constant 0 : index
    %c0_9 = arith.constant 0 : index
    %16 = vector.load %arg4[%c0_8, %c0_9] : memref<32x128xf32, #tpu.memory_space<vmem>>, vector<32x128xf32>
    %cst_10 = arith.constant dense<0.000000e+00> : vector<128x128xf32>
    %17 = tpu.matmul %15, %16, %cst_10 {dimension_numbers = #tpu.dot_dimension_numbers<[1], [0], [0], [1], [0, 0, 1, 1], [], []>} : vector<128x32xf32>, vector<32x128xf32>, vector<128x128xf32> -> vector<128x128xf32>
    %c0_11 = arith.constant 0 : index
    %c0_12 = arith.constant 0 : index
    %18 = vector.load %arg6[%c0_11, %c0_12] : memref<1x128xf32, #tpu.memory_space<vmem>>, vector<1x128xf32>
    %19 = vector.broadcast %18 : vector<1x128xf32> to vector<128x128xf32>
    %20 = arith.addf %17, %19 : vector<128x128xf32>
    %cst_13 = arith.constant 0.000000e+00 : f32
    %21 = vector.broadcast %cst_13 : f32 to vector<16x32xf32>
    %cst_14 = arith.constant 0.000000e+00 : f32
    %22 = vector.broadcast %cst_14 : f32 to vector<16x32xf32>
    %23 = vector.extract_strided_slice %20 {offsets = [0, 0], sizes = [16, 128], strides = [1, 1]} : vector<128x128xf32> to vector<16x128xf32>
    %c0_15 = arith.constant 0 : index
    %c0_16 = arith.constant 0 : index
    %24 = vector.load %arg5[%c0_15, %c0_16] : memref<32x128xf32, #tpu.memory_space<vmem>>, vector<32x128xf32>
    %cst_17 = arith.constant dense<0.000000e+00> : vector<16x128xf32>
    %25 = tpu.matmul %21, %24, %cst_17 {dimension_numbers = #tpu.dot_dimension_numbers<[1], [0], [0], [1], [0, 0, 1, 1], [], []>} : vector<16x32xf32>, vector<32x128xf32>, vector<16x128xf32> -> vector<16x128xf32>
    %26 = arith.addf %23, %25 : vector<16x128xf32>
    %27 = vector.extract_strided_slice %26 {offsets = [0, 0], sizes = [16, 32], strides = [1, 1]} : vector<16x128xf32> to vector<16x32xf32>
    %28 = arith.negf %27 : vector<16x32xf32>
    %29 = math.exp %28 : vector<16x32xf32>
    %cst_18 = arith.constant 1.000000e+00 : f32
    %30 = vector.broadcast %cst_18 : f32 to vector<16x32xf32>
    %31 = arith.addf %30, %29 : vector<16x32xf32>
    %32 = arith.divf %30, %31 : vector<16x32xf32>
    %33 = vector.extract_strided_slice %26 {offsets = [0, 32], sizes = [16, 32], strides = [1, 1]} : vector<16x128xf32> to vector<16x32xf32>
    %34 = arith.negf %33 : vector<16x32xf32>
    %35 = math.exp %34 : vector<16x32xf32>
    %cst_19 = arith.constant 1.000000e+00 : f32
    %36 = vector.broadcast %cst_19 : f32 to vector<16x32xf32>
    %37 = arith.addf %36, %35 : vector<16x32xf32>
    %38 = arith.divf %36, %37 : vector<16x32xf32>
    %39 = vector.extract_strided_slice %26 {offsets = [0, 64], sizes = [16, 32], strides = [1, 1]} : vector<16x128xf32> to vector<16x32xf32>
    %40 = math.tanh %39 : vector<16x32xf32>
    %41 = vector.extract_strided_slice %26 {offsets = [0, 96], sizes = [16, 32], strides = [1, 1]} : vector<16x128xf32> to vector<16x32xf32>
    %42 = arith.negf %41 : vector<16x32xf32>
    %43 = math.exp %42 : vector<16x32xf32>
    %cst_20 = arith.constant 1.000000e+00 : f32
    %44 = vector.broadcast %cst_20 : f32 to vector<16x32xf32>
    %45 = arith.addf %44, %43 : vector<16x32xf32>
    %46 = arith.divf %44, %45 : vector<16x32xf32>
    %47 = arith.mulf %38, %22 : vector<16x32xf32>
    %48 = arith.mulf %32, %40 : vector<16x32xf32>
    %49 = arith.addf %47, %48 : vector<16x32xf32>
    %50 = math.tanh %49 : vector<16x32xf32>
    %51 = arith.mulf %46, %50 : vector<16x32xf32>
    %52 = vector.extract_strided_slice %20 {offsets = [16, 0], sizes = [16, 128], strides = [1, 1]} : vector<128x128xf32> to vector<16x128xf32>
    %c0_21 = arith.constant 0 : index
    %c0_22 = arith.constant 0 : index
    %53 = vector.load %arg5[%c0_21, %c0_22] : memref<32x128xf32, #tpu.memory_space<vmem>>, vector<32x128xf32>
    %cst_23 = arith.constant dense<0.000000e+00> : vector<16x128xf32>
    %54 = tpu.matmul %51, %53, %cst_23 {dimension_numbers = #tpu.dot_dimension_numbers<[1], [0], [0], [1], [0, 0, 1, 1], [], []>} : vector<16x32xf32>, vector<32x128xf32>, vector<16x128xf32> -> vector<16x128xf32>
    %55 = arith.addf %52, %54 : vector<16x128xf32>
    %56 = vector.extract_strided_slice %55 {offsets = [0, 0], sizes = [16, 32], strides = [1, 1]} : vector<16x128xf32> to vector<16x32xf32>
    %57 = arith.negf %56 : vector<16x32xf32>
    %58 = math.exp %57 : vector<16x32xf32>
    %cst_24 = arith.constant 1.000000e+00 : f32
    %59 = vector.broadcast %cst_24 : f32 to vector<16x32xf32>
    %60 = arith.addf %59, %58 : vector<16x32xf32>
    %61 = arith.divf %59, %60 : vector<16x32xf32>
    %62 = vector.extract_strided_slice %55 {offsets = [0, 32], sizes = [16, 32], strides = [1, 1]} : vector<16x128xf32> to vector<16x32xf32>
    %63 = arith.negf %62 : vector<16x32xf32>
    %64 = math.exp %63 : vector<16x32xf32>
    %cst_25 = arith.constant 1.000000e+00 : f32
    %65 = vector.broadcast %cst_25 : f32 to vector<16x32xf32>
    %66 = arith.addf %65, %64 : vector<16x32xf32>
    %67 = arith.divf %65, %66 : vector<16x32xf32>
    %68 = vector.extract_strided_slice %55 {offsets = [0, 64], sizes = [16, 32], strides = [1, 1]} : vector<16x128xf32> to vector<16x32xf32>
    %69 = math.tanh %68 : vector<16x32xf32>
    %70 = vector.extract_strided_slice %55 {offsets = [0, 96], sizes = [16, 32], strides = [1, 1]} : vector<16x128xf32> to vector<16x32xf32>
    %71 = arith.negf %70 : vector<16x32xf32>
    %72 = math.exp %71 : vector<16x32xf32>
    %cst_26 = arith.constant 1.000000e+00 : f32
    %73 = vector.broadcast %cst_26 : f32 to vector<16x32xf32>
    %74 = arith.addf %73, %72 : vector<16x32xf32>
    %75 = arith.divf %73, %74 : vector<16x32xf32>
    %76 = arith.mulf %67, %49 : vector<16x32xf32>
    %77 = arith.mulf %61, %69 : vector<16x32xf32>
    %78 = arith.addf %76, %77 : vector<16x32xf32>
    %79 = math.tanh %78 : vector<16x32xf32>
    %80 = arith.mulf %75, %79 : vector<16x32xf32>
    %81 = vector.extract_strided_slice %20 {offsets = [32, 0], sizes = [16, 128], strides = [1, 1]} : vector<128x128xf32> to vector<16x128xf32>
    %c0_27 = arith.constant 0 : index
    %c0_28 = arith.constant 0 : index
    %82 = vector.load %arg5[%c0_27, %c0_28] : memref<32x128xf32, #tpu.memory_space<vmem>>, vector<32x128xf32>
    %cst_29 = arith.constant dense<0.000000e+00> : vector<16x128xf32>
    %83 = tpu.matmul %80, %82, %cst_29 {dimension_numbers = #tpu.dot_dimension_numbers<[1], [0], [0], [1], [0, 0, 1, 1], [], []>} : vector<16x32xf32>, vector<32x128xf32>, vector<16x128xf32> -> vector<16x128xf32>
    %84 = arith.addf %81, %83 : vector<16x128xf32>
    %85 = vector.extract_strided_slice %84 {offsets = [0, 0], sizes = [16, 32], strides = [1, 1]} : vector<16x128xf32> to vector<16x32xf32>
    %86 = arith.negf %85 : vector<16x32xf32>
    %87 = math.exp %86 : vector<16x32xf32>
    %cst_30 = arith.constant 1.000000e+00 : f32
    %88 = vector.broadcast %cst_30 : f32 to vector<16x32xf32>
    %89 = arith.addf %88, %87 : vector<16x32xf32>
    %90 = arith.divf %88, %89 : vector<16x32xf32>
    %91 = vector.extract_strided_slice %84 {offsets = [0, 32], sizes = [16, 32], strides = [1, 1]} : vector<16x128xf32> to vector<16x32xf32>
    %92 = arith.negf %91 : vector<16x32xf32>
    %93 = math.exp %92 : vector<16x32xf32>
    %cst_31 = arith.constant 1.000000e+00 : f32
    %94 = vector.broadcast %cst_31 : f32 to vector<16x32xf32>
    %95 = arith.addf %94, %93 : vector<16x32xf32>
    %96 = arith.divf %94, %95 : vector<16x32xf32>
    %97 = vector.extract_strided_slice %84 {offsets = [0, 64], sizes = [16, 32], strides = [1, 1]} : vector<16x128xf32> to vector<16x32xf32>
    %98 = math.tanh %97 : vector<16x32xf32>
    %99 = vector.extract_strided_slice %84 {offsets = [0, 96], sizes = [16, 32], strides = [1, 1]} : vector<16x128xf32> to vector<16x32xf32>
    %100 = arith.negf %99 : vector<16x32xf32>
    %101 = math.exp %100 : vector<16x32xf32>
    %cst_32 = arith.constant 1.000000e+00 : f32
    %102 = vector.broadcast %cst_32 : f32 to vector<16x32xf32>
    %103 = arith.addf %102, %101 : vector<16x32xf32>
    %104 = arith.divf %102, %103 : vector<16x32xf32>
    %105 = arith.mulf %96, %78 : vector<16x32xf32>
    %106 = arith.mulf %90, %98 : vector<16x32xf32>
    %107 = arith.addf %105, %106 : vector<16x32xf32>
    %108 = math.tanh %107 : vector<16x32xf32>
    %109 = arith.mulf %104, %108 : vector<16x32xf32>
    %110 = vector.extract_strided_slice %20 {offsets = [48, 0], sizes = [16, 128], strides = [1, 1]} : vector<128x128xf32> to vector<16x128xf32>
    %c0_33 = arith.constant 0 : index
    %c0_34 = arith.constant 0 : index
    %111 = vector.load %arg5[%c0_33, %c0_34] : memref<32x128xf32, #tpu.memory_space<vmem>>, vector<32x128xf32>
    %cst_35 = arith.constant dense<0.000000e+00> : vector<16x128xf32>
    %112 = tpu.matmul %109, %111, %cst_35 {dimension_numbers = #tpu.dot_dimension_numbers<[1], [0], [0], [1], [0, 0, 1, 1], [], []>} : vector<16x32xf32>, vector<32x128xf32>, vector<16x128xf32> -> vector<16x128xf32>
    %113 = arith.addf %110, %112 : vector<16x128xf32>
    %114 = vector.extract_strided_slice %113 {offsets = [0, 0], sizes = [16, 32], strides = [1, 1]} : vector<16x128xf32> to vector<16x32xf32>
    %115 = arith.negf %114 : vector<16x32xf32>
    %116 = math.exp %115 : vector<16x32xf32>
    %cst_36 = arith.constant 1.000000e+00 : f32
    %117 = vector.broadcast %cst_36 : f32 to vector<16x32xf32>
    %118 = arith.addf %117, %116 : vector<16x32xf32>
    %119 = arith.divf %117, %118 : vector<16x32xf32>
    %120 = vector.extract_strided_slice %113 {offsets = [0, 32], sizes = [16, 32], strides = [1, 1]} : vector<16x128xf32> to vector<16x32xf32>
    %121 = arith.negf %120 : vector<16x32xf32>
    %122 = math.exp %121 : vector<16x32xf32>
    %cst_37 = arith.constant 1.000000e+00 : f32
    %123 = vector.broadcast %cst_37 : f32 to vector<16x32xf32>
    %124 = arith.addf %123, %122 : vector<16x32xf32>
    %125 = arith.divf %123, %124 : vector<16x32xf32>
    %126 = vector.extract_strided_slice %113 {offsets = [0, 64], sizes = [16, 32], strides = [1, 1]} : vector<16x128xf32> to vector<16x32xf32>
    %127 = math.tanh %126 : vector<16x32xf32>
    %128 = vector.extract_strided_slice %113 {offsets = [0, 96], sizes = [16, 32], strides = [1, 1]} : vector<16x128xf32> to vector<16x32xf32>
    %129 = arith.negf %128 : vector<16x32xf32>
    %130 = math.exp %129 : vector<16x32xf32>
    %cst_38 = arith.constant 1.000000e+00 : f32
    %131 = vector.broadcast %cst_38 : f32 to vector<16x32xf32>
    %132 = arith.addf %131, %130 : vector<16x32xf32>
    %133 = arith.divf %131, %132 : vector<16x32xf32>
    %134 = arith.mulf %125, %107 : vector<16x32xf32>
    %135 = arith.mulf %119, %127 : vector<16x32xf32>
    %136 = arith.addf %134, %135 : vector<16x32xf32>
    %137 = math.tanh %136 : vector<16x32xf32>
    %138 = arith.mulf %133, %137 : vector<16x32xf32>
    %139 = vector.extract_strided_slice %20 {offsets = [64, 0], sizes = [16, 128], strides = [1, 1]} : vector<128x128xf32> to vector<16x128xf32>
    %c0_39 = arith.constant 0 : index
    %c0_40 = arith.constant 0 : index
    %140 = vector.load %arg5[%c0_39, %c0_40] : memref<32x128xf32, #tpu.memory_space<vmem>>, vector<32x128xf32>
    %cst_41 = arith.constant dense<0.000000e+00> : vector<16x128xf32>
    %141 = tpu.matmul %138, %140, %cst_41 {dimension_numbers = #tpu.dot_dimension_numbers<[1], [0], [0], [1], [0, 0, 1, 1], [], []>} : vector<16x32xf32>, vector<32x128xf32>, vector<16x128xf32> -> vector<16x128xf32>
    %142 = arith.addf %139, %141 : vector<16x128xf32>
    %143 = vector.extract_strided_slice %142 {offsets = [0, 0], sizes = [16, 32], strides = [1, 1]} : vector<16x128xf32> to vector<16x32xf32>
    %144 = arith.negf %143 : vector<16x32xf32>
    %145 = math.exp %144 : vector<16x32xf32>
    %cst_42 = arith.constant 1.000000e+00 : f32
    %146 = vector.broadcast %cst_42 : f32 to vector<16x32xf32>
    %147 = arith.addf %146, %145 : vector<16x32xf32>
    %148 = arith.divf %146, %147 : vector<16x32xf32>
    %149 = vector.extract_strided_slice %142 {offsets = [0, 32], sizes = [16, 32], strides = [1, 1]} : vector<16x128xf32> to vector<16x32xf32>
    %150 = arith.negf %149 : vector<16x32xf32>
    %151 = math.exp %150 : vector<16x32xf32>
    %cst_43 = arith.constant 1.000000e+00 : f32
    %152 = vector.broadcast %cst_43 : f32 to vector<16x32xf32>
    %153 = arith.addf %152, %151 : vector<16x32xf32>
    %154 = arith.divf %152, %153 : vector<16x32xf32>
    %155 = vector.extract_strided_slice %142 {offsets = [0, 64], sizes = [16, 32], strides = [1, 1]} : vector<16x128xf32> to vector<16x32xf32>
    %156 = math.tanh %155 : vector<16x32xf32>
    %157 = vector.extract_strided_slice %142 {offsets = [0, 96], sizes = [16, 32], strides = [1, 1]} : vector<16x128xf32> to vector<16x32xf32>
    %158 = arith.negf %157 : vector<16x32xf32>
    %159 = math.exp %158 : vector<16x32xf32>
    %cst_44 = arith.constant 1.000000e+00 : f32
    %160 = vector.broadcast %cst_44 : f32 to vector<16x32xf32>
    %161 = arith.addf %160, %159 : vector<16x32xf32>
    %162 = arith.divf %160, %161 : vector<16x32xf32>
    %163 = arith.mulf %154, %136 : vector<16x32xf32>
    %164 = arith.mulf %148, %156 : vector<16x32xf32>
    %165 = arith.addf %163, %164 : vector<16x32xf32>
    %166 = math.tanh %165 : vector<16x32xf32>
    %167 = arith.mulf %162, %166 : vector<16x32xf32>
    %168 = vector.extract_strided_slice %20 {offsets = [80, 0], sizes = [16, 128], strides = [1, 1]} : vector<128x128xf32> to vector<16x128xf32>
    %c0_45 = arith.constant 0 : index
    %c0_46 = arith.constant 0 : index
    %169 = vector.load %arg5[%c0_45, %c0_46] : memref<32x128xf32, #tpu.memory_space<vmem>>, vector<32x128xf32>
    %cst_47 = arith.constant dense<0.000000e+00> : vector<16x128xf32>
    %170 = tpu.matmul %167, %169, %cst_47 {dimension_numbers = #tpu.dot_dimension_numbers<[1], [0], [0], [1], [0, 0, 1, 1], [], []>} : vector<16x32xf32>, vector<32x128xf32>, vector<16x128xf32> -> vector<16x128xf32>
    %171 = arith.addf %168, %170 : vector<16x128xf32>
    %172 = vector.extract_strided_slice %171 {offsets = [0, 0], sizes = [16, 32], strides = [1, 1]} : vector<16x128xf32> to vector<16x32xf32>
    %173 = arith.negf %172 : vector<16x32xf32>
    %174 = math.exp %173 : vector<16x32xf32>
    %cst_48 = arith.constant 1.000000e+00 : f32
    %175 = vector.broadcast %cst_48 : f32 to vector<16x32xf32>
    %176 = arith.addf %175, %174 : vector<16x32xf32>
    %177 = arith.divf %175, %176 : vector<16x32xf32>
    %178 = vector.extract_strided_slice %171 {offsets = [0, 32], sizes = [16, 32], strides = [1, 1]} : vector<16x128xf32> to vector<16x32xf32>
    %179 = arith.negf %178 : vector<16x32xf32>
    %180 = math.exp %179 : vector<16x32xf32>
    %cst_49 = arith.constant 1.000000e+00 : f32
    %181 = vector.broadcast %cst_49 : f32 to vector<16x32xf32>
    %182 = arith.addf %181, %180 : vector<16x32xf32>
    %183 = arith.divf %181, %182 : vector<16x32xf32>
    %184 = vector.extract_strided_slice %171 {offsets = [0, 64], sizes = [16, 32], strides = [1, 1]} : vector<16x128xf32> to vector<16x32xf32>
    %185 = math.tanh %184 : vector<16x32xf32>
    %186 = vector.extract_strided_slice %171 {offsets = [0, 96], sizes = [16, 32], strides = [1, 1]} : vector<16x128xf32> to vector<16x32xf32>
    %187 = arith.negf %186 : vector<16x32xf32>
    %188 = math.exp %187 : vector<16x32xf32>
    %cst_50 = arith.constant 1.000000e+00 : f32
    %189 = vector.broadcast %cst_50 : f32 to vector<16x32xf32>
    %190 = arith.addf %189, %188 : vector<16x32xf32>
    %191 = arith.divf %189, %190 : vector<16x32xf32>
    %192 = arith.mulf %183, %165 : vector<16x32xf32>
    %193 = arith.mulf %177, %185 : vector<16x32xf32>
    %194 = arith.addf %192, %193 : vector<16x32xf32>
    %195 = math.tanh %194 : vector<16x32xf32>
    %196 = arith.mulf %191, %195 : vector<16x32xf32>
    %197 = vector.extract_strided_slice %20 {offsets = [96, 0], sizes = [16, 128], strides = [1, 1]} : vector<128x128xf32> to vector<16x128xf32>
    %c0_51 = arith.constant 0 : index
    %c0_52 = arith.constant 0 : index
    %198 = vector.load %arg5[%c0_51, %c0_52] : memref<32x128xf32, #tpu.memory_space<vmem>>, vector<32x128xf32>
    %cst_53 = arith.constant dense<0.000000e+00> : vector<16x128xf32>
    %199 = tpu.matmul %196, %198, %cst_53 {dimension_numbers = #tpu.dot_dimension_numbers<[1], [0], [0], [1], [0, 0, 1, 1], [], []>} : vector<16x32xf32>, vector<32x128xf32>, vector<16x128xf32> -> vector<16x128xf32>
    %200 = arith.addf %197, %199 : vector<16x128xf32>
    %201 = vector.extract_strided_slice %200 {offsets = [0, 0], sizes = [16, 32], strides = [1, 1]} : vector<16x128xf32> to vector<16x32xf32>
    %202 = arith.negf %201 : vector<16x32xf32>
    %203 = math.exp %202 : vector<16x32xf32>
    %cst_54 = arith.constant 1.000000e+00 : f32
    %204 = vector.broadcast %cst_54 : f32 to vector<16x32xf32>
    %205 = arith.addf %204, %203 : vector<16x32xf32>
    %206 = arith.divf %204, %205 : vector<16x32xf32>
    %207 = vector.extract_strided_slice %200 {offsets = [0, 32], sizes = [16, 32], strides = [1, 1]} : vector<16x128xf32> to vector<16x32xf32>
    %208 = arith.negf %207 : vector<16x32xf32>
    %209 = math.exp %208 : vector<16x32xf32>
    %cst_55 = arith.constant 1.000000e+00 : f32
    %210 = vector.broadcast %cst_55 : f32 to vector<16x32xf32>
    %211 = arith.addf %210, %209 : vector<16x32xf32>
    %212 = arith.divf %210, %211 : vector<16x32xf32>
    %213 = vector.extract_strided_slice %200 {offsets = [0, 64], sizes = [16, 32], strides = [1, 1]} : vector<16x128xf32> to vector<16x32xf32>
    %214 = math.tanh %213 : vector<16x32xf32>
    %215 = vector.extract_strided_slice %200 {offsets = [0, 96], sizes = [16, 32], strides = [1, 1]} : vector<16x128xf32> to vector<16x32xf32>
    %216 = arith.negf %215 : vector<16x32xf32>
    %217 = math.exp %216 : vector<16x32xf32>
    %cst_56 = arith.constant 1.000000e+00 : f32
    %218 = vector.broadcast %cst_56 : f32 to vector<16x32xf32>
    %219 = arith.addf %218, %217 : vector<16x32xf32>
    %220 = arith.divf %218, %219 : vector<16x32xf32>
    %221 = arith.mulf %212, %194 : vector<16x32xf32>
    %222 = arith.mulf %206, %214 : vector<16x32xf32>
    %223 = arith.addf %221, %222 : vector<16x32xf32>
    %224 = math.tanh %223 : vector<16x32xf32>
    %225 = arith.mulf %220, %224 : vector<16x32xf32>
    %226 = vector.extract_strided_slice %20 {offsets = [112, 0], sizes = [16, 128], strides = [1, 1]} : vector<128x128xf32> to vector<16x128xf32>
    %c0_57 = arith.constant 0 : index
    %c0_58 = arith.constant 0 : index
    %227 = vector.load %arg5[%c0_57, %c0_58] : memref<32x128xf32, #tpu.memory_space<vmem>>, vector<32x128xf32>
    %cst_59 = arith.constant dense<0.000000e+00> : vector<16x128xf32>
    %228 = tpu.matmul %225, %227, %cst_59 {dimension_numbers = #tpu.dot_dimension_numbers<[1], [0], [0], [1], [0, 0, 1, 1], [], []>} : vector<16x32xf32>, vector<32x128xf32>, vector<16x128xf32> -> vector<16x128xf32>
    %229 = arith.addf %226, %228 : vector<16x128xf32>
    %230 = vector.extract_strided_slice %229 {offsets = [0, 0], sizes = [16, 32], strides = [1, 1]} : vector<16x128xf32> to vector<16x32xf32>
    %231 = arith.negf %230 : vector<16x32xf32>
    %232 = math.exp %231 : vector<16x32xf32>
    %cst_60 = arith.constant 1.000000e+00 : f32
    %233 = vector.broadcast %cst_60 : f32 to vector<16x32xf32>
    %234 = arith.addf %233, %232 : vector<16x32xf32>
    %235 = arith.divf %233, %234 : vector<16x32xf32>
    %236 = vector.extract_strided_slice %229 {offsets = [0, 32], sizes = [16, 32], strides = [1, 1]} : vector<16x128xf32> to vector<16x32xf32>
    %237 = arith.negf %236 : vector<16x32xf32>
    %238 = math.exp %237 : vector<16x32xf32>
    %cst_61 = arith.constant 1.000000e+00 : f32
    %239 = vector.broadcast %cst_61 : f32 to vector<16x32xf32>
    %240 = arith.addf %239, %238 : vector<16x32xf32>
    %241 = arith.divf %239, %240 : vector<16x32xf32>
    %242 = vector.extract_strided_slice %229 {offsets = [0, 64], sizes = [16, 32], strides = [1, 1]} : vector<16x128xf32> to vector<16x32xf32>
    %243 = math.tanh %242 : vector<16x32xf32>
    %244 = vector.extract_strided_slice %229 {offsets = [0, 96], sizes = [16, 32], strides = [1, 1]} : vector<16x128xf32> to vector<16x32xf32>
    %245 = arith.negf %244 : vector<16x32xf32>
    %246 = math.exp %245 : vector<16x32xf32>
    %cst_62 = arith.constant 1.000000e+00 : f32
    %247 = vector.broadcast %cst_62 : f32 to vector<16x32xf32>
    %248 = arith.addf %247, %246 : vector<16x32xf32>
    %249 = arith.divf %247, %248 : vector<16x32xf32>
    %250 = arith.mulf %241, %223 : vector<16x32xf32>
    %251 = arith.mulf %235, %243 : vector<16x32xf32>
    %252 = arith.addf %250, %251 : vector<16x32xf32>
    %253 = math.tanh %252 : vector<16x32xf32>
    %254 = arith.mulf %249, %253 : vector<16x32xf32>
    %c0_63 = arith.constant 0 : index
    %c0_64 = arith.constant 0 : index
    %255 = vector.load %arg7[%c0_63, %c0_64] : memref<16x16xf32, #tpu.memory_space<vmem>>, vector<16x16xf32>
    %cst_65 = arith.constant 0.000000e+00 : f32
    %256 = vector.broadcast %cst_65 : f32 to vector<16x48xf32>
    %257 = tpu.concatenate %7, %254, %255, %256 in 1 : vector<16x32xf32>, vector<16x32xf32>, vector<16x16xf32>, vector<16x48xf32> -> vector<16x128xf32>
    %c0_66 = arith.constant 0 : index
    %c0_67 = arith.constant 0 : index
    %258 = vector.load %arg8[%c0_66, %c0_67] : memref<16x128xf32, #tpu.memory_space<vmem>>, vector<16x128xf32>
    %259 = arith.mulf %257, %258 : vector<16x128xf32>
    %c0_68 = arith.constant 0 : index
    %c0_69 = arith.constant 0 : index
    %260 = vector.load %arg9[%c0_68, %c0_69] : memref<16x128xf32, #tpu.memory_space<vmem>>, vector<16x128xf32>
    tpu.vector_store %arg9[%c0_68, %c0_69], %259 {strides = array<i32>} : memref<16x128xf32, #tpu.memory_space<vmem>>, vector<16x128xf32>,
    return
  }
}

</mosaic_0001>

<bundles_post_ra>
// kernel: tpu_custom_call.1
= control target key start
LH: loop header
LB: loop body
LE: loop exit
PB: predicated region body
PF: predicated region fallthrough
CT: control target
= control target key end

     0   :  { %v1591_v2 = vmov 0   ;;  %s2116_s0 = inlined_call_operand.vmem [shape: s32[16,1], index: 0, kind: input, shape index: {}]   ;;  %s2117_s1 = inlined_call_operand.vmem [shape: s32[128,1], index: 1, kind: input, shape index: {}]   ;;  %s2118_s2 = inlined_call_operand.vmem [shape: f32[128,32], index: 2, kind: input, shape index: {}]   ;;  %s2119_s3 = inlined_call_operand.vmem [shape: f32[128,32], index: 3, kind: input, shape index: {}]   ;;  %s2120_s4 = inlined_call_operand.vmem [shape: f32[32,128], index: 4, kind: input, shape index: {}]   ;;  %s2121_s5 = inlined_call_operand.vmem [shape: f32[32,128], index: 5, kind: input, shape index: {}]   ;;  %s2122_s6 = inlined_call_operand.vmem [shape: f32[1,128], index: 6, kind: input, shape index: {}]   ;;  %s2123_s7 = inlined_call_operand.vmem [shape: f32[16,16], index: 7, kind: input, shape index: {}]   ;;  %s2124_s8 = inlined_call_operand.vmem [shape: f32[16,128], index: 8, kind: input, shape index: {}]   ;;  %s2125_s9 = inlined_call_operand.hbm [shape: f32[16,128], index: 9, kind: output, shape index: {}]  }
   0x1   :  { %v88_v0 = vld [vmem:[%s2117_s1] sm:$0xff]  ;;  %v215_v1 = vld [vmem:[%s2119_s3 + $0x78] sm:$0xff]  ;;  %1432 = vset.pattern.permute.xlu0 %v1591_v2  ;;  %v214_v3 = vld [vmem:[%s2119_s3 + $0x70] sm:$0xff]  ;;  %1433 = vset.pattern.permute.xlu1 %v1591_v2 }
   0x2   :  { %216 = vmatpush.msra.mxu1 %v215_v1  ;;  %105 = vperm.xlu0 %1432, %v88_v0   ;;  %v213_v4 = vld [vmem:[%s2119_s3 + $0x68] sm:$0xff]  ;;  %v35_v5 = vld [vmem:[%s2116_s0] sm:$0xff]  ;;  %v211_v7 = vld [vmem:[%s2119_s3 + $0x58] sm:$0xff] }
   0x3   :  { %38 = vperm.xlu1 %1433, %v35_v5   ;;  %v212_v6 = vld [vmem:[%s2119_s3 + $0x60] sm:$0xff]  ;;  %1434 = vset.pattern.permute.xlu2 %v1591_v2  ;;  %v89_v8 = vld [vmem:[%s2117_s1 + $0x8] sm:$0xff] }
   0x4   :  { %217 = vmatpush.msra.mxu1 %v214_v3  ;;  %1404 = vmatpush.msra.mxu3 %v215_v1 }
   0x6   :  { %218 = vmatpush.msra.mxu1 %v213_v4  ;;  %1405 = vmatpush.msra.mxu3 %v214_v3 }
   0x8   :  { %219 = vmatpush.msra.mxu1 %v212_v6 }
   0x9   :  { %14 = vsyncpa [#allocation3], 0  ;;  %v210_v9 = vld [vmem:[%s2119_s3 + $0x50] sm:$0xff]  ;;  %v36_v10 = vld [vmem:[%s2116_s0 + $0x8] sm:$0xff]  ;;  %1406 = vmatpush.msra.mxu3 %v213_v4  ;;  %v33_v35 = vlaneseq  ;;  %v1592_v42 = vmov 1.0   ;;  %vm289_vm4 = vcmask 261120  }
   0xa   :  { %220 = vmatpush.msra.mxu1 %v211_v7  ;;  %108 = vperm.xlu0 %1432, %v89_v8   ;;  %v209_v11 = vld [vmem:[%s2119_s3 + $0x48] sm:$0xff]  ;;  %v208_v12 = vld [vmem:[%s2119_s3 + $0x40] sm:$0xff]  ;;  %v207_v13 = vld [vmem:[%s2119_s3 + $0x38] sm:$0xff]  ;;  %v1593_v55 = vmov 0.0   ;;  %s1594_s30 = smov 64   ;;  %s1595_s12 = smov 32  }
   0xb   :  { %1407 = vmatpush.msra.mxu3 %v212_v6  ;;  %41 = vperm.xlu1 %1433, %v36_v10   ;;  %v206_v14 = vld [vmem:[%s2119_s3 + $0x30] sm:$0xff]  ;;  %v91_v15 = vld [vmem:[%s2117_s1 + $0x18] sm:$0xff]  ;;  %v205_v16 = vld [vmem:[%s2119_s3 + $0x28] sm:$0xff]  ;;  %v1757_v38 = vand.u32 127, %v33_v35  ;;  %s1310_s17 = sshll.u32 %s2125_s9, 4  ;;  %s1597_s20 = smov 128   ;;  %s1311_s17 = int_to_ptr.hbm [resolvable:$true] %s1310_s17 }
   0xc   :  { %221 = vmatpush.msra.mxu1 %v210_v9  ;;  %v204_v17 = vld [vmem:[%s2119_s3 + $0x20] sm:$0xff]  ;;  %v203_v18 = vld [vmem:[%s2119_s3 + $0x18] sm:$0xff]  ;;  %v202_v19 = vld [vmem:[%s2119_s3 + $0x10] sm:$0xff]  ;;  %s1598_s21 = smov 8  }
   0xd   :  { %1408 = vmatpush.msra.mxu3 %v211_v7  ;;  %v201_v20 = vld [vmem:[%s2119_s3 + $0x8] sm:$0xff]  ;;  %v200_v21 = vld [vmem:[%s2119_s3] sm:$0xff]  ;;  %v64_v22 = vld [vmem:[%s2118_s2 + $0x78] sm:$0xff] }
   0xe   :  { %222 = vmatpush.msra.mxu1 %v209_v11  ;;  %v63_v23 = vld [vmem:[%s2118_s2 + $0x70] sm:$0xff]  ;;  %65 = vmatpush.msra.mxu0 %v64_v22  ;;  %v62_v24 = vld [vmem:[%s2118_s2 + $0x68] sm:$0xff]  ;;  %v61_v25 = vld [vmem:[%s2118_s2 + $0x60] sm:$0xff] }
   0xf   :  { %1409 = vmatpush.msra.mxu3 %v210_v9  ;;  %v60_v26 = vld [vmem:[%s2118_s2 + $0x58] sm:$0xff]  ;;  %v59_v27 = vld [vmem:[%s2118_s2 + $0x50] sm:$0xff]  ;;  %v58_v29 = vld [vmem:[%s2118_s2 + $0x48] sm:$0xff] }
  0x10   :  { %223 = vmatpush.msra.mxu1 %v208_v12  ;;  %66 = vmatpush.msra.mxu0 %v63_v23  ;;  %v284_v28 = vld [vmem:[%s2120_s4 + $0x18] sm:$0xff]  ;;  %v283_v30 = vld [vmem:[%s2120_s4 + $0x10] sm:$0xff]  ;;  %v57_v31 = vld [vmem:[%s2118_s2 + $0x40] sm:$0xff] }
  0x11   :  { %1410 = vmatpush.msra.mxu3 %v209_v11  ;;  %1420 = vmatpush.msra.mxu2 %v284_v28  ;;  %v282_v32 = vld [vmem:[%s2120_s4 + $0x8] sm:$0xff]  ;;  %v56_v33 = vld [vmem:[%s2118_s2 + $0x38] sm:$0xff]  ;;  %v281_v34 = vld [vmem:[%s2120_s4] sm:$0xff] }
  0x12   :  { %224 = vmatpush.msra.mxu1 %v207_v13  ;;  %67 = vmatpush.msra.mxu0 %v62_v24  ;;  %v55_v36 = vld [vmem:[%s2118_s2 + $0x30] sm:$0xff]  ;;  %v54_v37 = vld [vmem:[%s2118_s2 + $0x28] sm:$0xff]  ;;  %v53_v39 = vld [vmem:[%s2118_s2 + $0x20] sm:$0xff] }
  0x13   :  { %1411 = vmatpush.msra.mxu3 %v208_v12  ;;  %114 = vperm.xlu1 %1433, %v91_v15   ;;  %v52_v41 = vld [vmem:[%s2118_s2 + $0x18] sm:$0xff]  ;;  %v51_v43 = vld [vmem:[%s2118_s2 + $0x10] sm:$0xff]  ;;  %v50_v45 = vld [vmem:[%s2118_s2 + $0x8] sm:$0xff] }
  0x14   :  { %225 = vmatpush.msra.mxu1 %v206_v14  ;;  %68 = vmatpush.msra.mxu0 %v61_v25  ;;  %v49_v46 = vld [vmem:[%s2118_s2] sm:$0xff]  ;;  %v1785_v49 = vld [vmem:[%s2121_s5 + $0x18] sm:$0xff]  ;;  %v1790_v50 = vld [vmem:[%s2121_s5 + $0x10] sm:$0xff] }
  0x15   :  { %1412 = vmatpush.msra.mxu3 %v207_v13  ;;  %1421 = vmatpush.msra.mxu2 %v283_v30  ;;  %v1797_v51 = vld [vmem:[%s2121_s5 + $0x8] sm:$0xff]  ;;  %v1804_v52 = vld [vmem:[%s2121_s5] sm:$0xff]  ;;  %v90_v4 = vld [vmem:[%s2117_s1 + $0x10] sm:$0xff] }
  0x16   :  { %226 = vmatpush.msra.mxu1 %v205_v16  ;;  %69 = vmatpush.msra.mxu0 %v60_v26  ;;  %v1827_v59 = vld [vmem:[%s2122_s6] ss:$0 sm:$0xff] }
  0x17   :  { %1413 = vmatpush.msra.mxu3 %v206_v14  ;;  %1422 = vmatpush.msra.mxu2 %v282_v32  ;;  %v100_v25 = vld [vmem:[%s2117_s1 + $0x60] sm:$0xff] }
  0x18   :  { %227 = vmatpush.msra.mxu1 %v204_v17  ;;  %70 = vmatpush.msra.mxu0 %v59_v27 }
  0x19   :  { %1414 = vmatpush.msra.mxu3 %v205_v16  ;;  %1423 = vmatpush.msra.mxu2 %v281_v34 }
  0x1a   :  { %228 = vmatpush.msra.mxu1 %v203_v18  ;;  %71 = vmatpush.msra.mxu0 %v58_v29  ;;  %v102_v29 = vld [vmem:[%s2117_s1 + $0x70] sm:$0xff] }
  0x1b   :  { %1415 = vmatpush.msra.mxu3 %v204_v17 }
  0x1c   :  { %229 = vmatpush.msra.mxu1 %v202_v19  ;;  %72 = vmatpush.msra.mxu0 %v57_v31 }
  0x1d   :  { %1416 = vmatpush.msra.mxu3 %v203_v18 }
  0x1e   :  { %230 = vmatpush.msra.mxu1 %v201_v20  ;;  %73 = vmatpush.msra.mxu0 %v56_v33 }
  0x1f   :  { %1417 = vmatpush.msra.mxu3 %v202_v19 }
  0x20   :  { %231 = vmatpush.msra.mxu1 %v200_v21  ;;  %74 = vmatpush.msra.mxu0 %v55_v36 }
  0x21   :  { %1418 = vmatpush.msra.mxu3 %v201_v20 }
  0x22   :  { %75 = vmatpush.msra.mxu0 %v54_v37 }
  0x23   :  { %1419 = vmatpush.msra.mxu3 %v200_v21 }
  0x24   :  { %76 = vmatpush.msra.mxu0 %v53_v39 }
  0x25   :  { %531 = vmatpush.msrb.mxu3 %v1785_v49 }
  0x26   :  { %77 = vmatpush.msra.mxu0 %v52_v41 }
  0x27   :  { %532 = vmatpush.msrb.mxu3 %v1790_v50 }
  0x28   :  { %78 = vmatpush.msra.mxu0 %v51_v43 }
  0x29   :  { %533 = vmatpush.msrb.mxu3 %v1797_v51 }
  0x2a   :  { %79 = vmatpush.msra.mxu0 %v50_v45 }
  0x2b   :  { %534 = vmatpush.msrb.mxu3 %v1804_v52 }
  0x2c   :  { %80 = vmatpush.msra.mxu0 %v49_v46 }
  0x2e   :  { %350 = vmatpush.msrb.mxu0 %v284_v28 }
  0x30   :  { %351 = vmatpush.msrb.mxu0 %v283_v30 }
  0x32   :  { %352 = vmatpush.msrb.mxu0 %v282_v32 }
  0x34   :  { %353 = vmatpush.msrb.mxu0 %v281_v34 }
  0x74   :  { %v106_v40 = vpop.permute.xlu0 %105 }
  0x75   :  { %vm152_vm0 = vcmp.eq.s32.totalorder %v1757_v38, %v106_v40  ;;  %v39_v44 = vpop.permute.xlu1 %38 }
  0x76   :  { %1342 = vmatmul.msk.f32.vlgmr.msra.gmra.mxu1 %vm152_vm0, %v1592_v42  ;;  %vm43_vm1 = vcmp.eq.s32.totalorder %v1757_v38, %v39_v44 }
  0x77   :  { %1324 = vmatmul.msk.f32.vlgmr.msra.gmra.mxu0 %vm43_vm1, %v1592_v42 }
  0x78   :  { %422 = vmatpush.msra.mxu0 %v1785_v49 }
  0x7a   :  { %423 = vmatpush.msra.mxu0 %v1790_v50 }
  0x7c   :  { %v109_v47 = vpop.permute.xlu0 %108  ;;  %424 = vmatpush.msra.mxu0 %v1797_v51 }
  0x7d   :  { %vm153_vm2 = vcmp.eq.s32.totalorder %v1757_v38, %v109_v47  ;;  %v42_v48 = vpop.permute.xlu1 %41  ;;  %v101_v47 = vld [vmem:[%s2117_s1 + $0x68] sm:$0xff] }
  0x7e   :  { %1343 = vmatmul.msk.f32.gmra.mxu1 %vm153_vm2, %v1592_v42  ;;  %vm44_vm3 = vcmp.eq.s32.totalorder %v1757_v38, %v42_v48  ;;  %425 = vmatpush.msra.mxu0 %v1804_v52 }
  0x7f   :  { %1325 = vmatmul.msk.f32.gmra.mxu0 %vm44_vm3, %v1592_v42 }
  0x85   :  { %v115_v28 = vpop.permute.xlu1 %114 }
  0x86   :  { %vm155_vm10 = vcmp.eq.s32.totalorder %v1757_v38, %v115_v28 }
  0xf3   :  { %v233_v53 = vpop.f32.mrf.mxu1 }
  0xf4   :  { %1358 = vmatmul.msk.f32.vlgmr.msrb.gmra.mxu0 %vm289_vm4, %v233_v53  ;;  %v1820_v56 = vpop.f32.mrf.mxu0 }
  0xf5   :  { %749 = vmatpush.msrb.mxu0 %v1785_v49 }
  0xf7   :  { %750 = vmatpush.msrb.mxu0 %v1790_v50 }
  0xf9   :  { %751 = vmatpush.msrb.mxu0 %v1797_v51 }
  0xfb   :  { %v236_v54 = vpop.f32.mrf.mxu1  ;;  %752 = vmatpush.msrb.mxu0 %v1804_v52 }
  0xfc   :  { %1359 = vmatmul.msk.f32.vlgmr.msra.gmra.mxu2 %vm289_vm4, %v236_v54  ;;  %426 = vmatmul.f32.vlgmr.msra.gmra.mxu0 %v1593_v55  ;;  %v1822_v57 = vpop.f32.mrf.mxu0 }
  0xfd   :  { %967 = vmatpush.msra.mxu0 %v1785_v49 }
  0xff   :  { %968 = vmatpush.msra.mxu0 %v1790_v50 }
 0x101   :  { %969 = vmatpush.msra.mxu0 %v1797_v51 }
 0x103   :  { %970 = vmatpush.msra.mxu0 %v1804_v52 }
 0x104   :  { %429 = vmatmul.f32.gmra.mxu0 %v1593_v55 }
 0x171   :  { %v355_v58 = vpop.f32.mrf.mxu0 }
 0x172   :  { %v356_v60 = vadd.f32 %v1827_v59, %v355_v58 }
 0x179   :  { %v427_v61 = vpop.f32.mrf.mxu0 }
 0x17a   :  { %v433_v62 = vadd.f32 %v427_v61, %v356_v60  ;;  %v103_v61 = vld [vmem:[%s2117_s1 + $0x78] sm:$0xff] }
 0x17c   :  { %1436 = vtanh.f32 %v433_v62  ;;  %v1374_v6 = vmul.f32 -1.442695, %v433_v62 }
 0x17f   :  { %v358_v63 = vpop.f32.mrf.mxu2 }
 0x180   :  { %v359_v0 = vadd.f32 %v1827_v59, %v358_v63 }
 0x181   :  { %v430_v1 = vpop.f32.mrf.mxu0 }
 0x182   :  { %v1437_v2 = vpop.eup %1436  ;;  %v434_v3 = vadd.f32 %v430_v1, %v359_v0  ;;  %v92_v1 = vld [vmem:[%s2117_s1 + $0x20] sm:$0xff] }
 0x183   :  { %479 = vrot.lane.b32.xlu2 %v1437_v2, %s1594_s30 }
 0x184   :  { %1438 = vtanh.f32 %v434_v3  ;;  %v1375_v12 = vmul.f32 -1.442695, %v434_v3 }
 0x185   :  { %1440 = vpow2.f32 %v1374_v6 }
 0x18a   :  { %v1439_v5 = vpop.eup %1438 }
 0x18b   :  { %481 = vrot.lane.b32.xlu0 %v1439_v5, %s1594_s30  ;;  %111 = vperm.xlu2 %1434, %v90_v4   ;;  %v1441_v7 = vpop.eup %1440 }
 0x18c   :  { %v441_v8 = vadd.f32 1.0, %v1441_v7 }
 0x18e   :  { %1442 = vrcp.f32 %v441_v8  ;;  %v454_v15 = vand.u32 2147483648, %v441_v8  ;;  %vm448_vm6 = vweird.f32 %v441_v8  ;;  %v452_v16 = vand.u32 2147483647, %v441_v8 }
 0x18f   :  { %1444 = vpow2.f32 %v1375_v12 }
 0x190   :  { %v455_v19 = vor.u32 1.1754944e-38, %v454_v15  ;;  %vm453_vm8 = vcmp.eq.f32.partialorder %v452_v16, 8.507059e+37 }
 0x194   :  { %v1443_v9 = vpop.eup %1442 }
 0x195   :  { %v444_v10 = vmul.f32 %v1443_v9, %v441_v8  ;;  %vm449_vm5 = vweird.f32 %v1443_v9  ;;  %v1445_v17 = vpop.eup %1444 }
 0x196   :  { %vm450_vm7 = vmor %vm448_vm6, %vm449_vm5  ;;  %v442_v20 = vadd.f32 1.0, %v1445_v17 }
 0x197   :  { %v445_v11 = vsub.f32 1.0, %v444_v10 }
 0x198   :  { %1446 = vrcp.f32 %v442_v20  ;;  %v469_v33 = vand.u32 2147483648, %v442_v20  ;;  %vm463_vm12 = vweird.f32 %v442_v20  ;;  %v467_v34 = vand.u32 2147483647, %v442_v20 }
 0x199   :  { %v446_v13 = vmul.f32 %v1443_v9, %v445_v11 }
 0x19a   :  { %v470_v36 = vor.u32 1.1754944e-38, %v469_v33  ;;  %vm468_vm14 = vcmp.eq.f32.partialorder %v467_v34, 8.507059e+37 }
 0x19b   :  { %v447_v14 = vadd.f32 %v1443_v9, %v446_v13 }
 0x19d   :  { %v451_v18 = vsel %vm450_vm7, %v1443_v9, %v447_v14 }
 0x19e   :  { %v456_v22 = vsel %vm453_vm8, %v455_v19, %v451_v18  ;;  %v1447_v26 = vpop.eup %1446  ;;  %v93_v19 = vld [vmem:[%s2117_s1 + $0x28] sm:$0xff] }
 0x19f   :  { %v459_v27 = vmul.f32 %v1447_v26, %v442_v20  ;;  %vm464_vm11 = vweird.f32 %v1447_v26  ;;  %v475_v41 = vmul.f32 0.0, %v456_v22 }
 0x1a0   :  { %vm465_vm13 = vmor %vm463_vm12, %vm464_vm11 }
 0x1a1   :  { %v460_v30 = vsub.f32 1.0, %v459_v27 }
 0x1a3   :  { %v461_v31 = vmul.f32 %v1447_v26, %v460_v30 }
 0x1a5   :  { %v462_v32 = vadd.f32 %v1447_v26, %v461_v31 }
 0x1a7   :  { %v466_v35 = vsel %vm465_vm13, %v1447_v26, %v462_v32 }
 0x1a8   :  { %v471_v39 = vsel %vm468_vm14, %v470_v36, %v466_v35 }
 0x1a9   :  { %v476_v54 = vmul.f32 0.0, %v471_v39 }
 0x1dd   :  { %v480_v21 = vpop.permute.xlu2 %479 }
 0x1de   :  { %v485_v23 = vmul.f32 %v480_v21, %v456_v22 }
 0x1e0   :  { %489 = vrot.lane.b32.xlu2 %v485_v23, %s1595_s12 }
 0x1e5   :  { %v112_v24 = vpop.permute.xlu2 %111 }
 0x1e6   :  { %vm154_vm9 = vcmp.eq.s32.totalorder %v1757_v38, %v112_v24 }
 0x1e7   :  { %1344 = vmatmul.msk.f32.gmra.mxu1 %vm154_vm9, %v1592_v42 }
 0x1e8   :  { %141 = vperm.xlu2 %1434, %v100_v25  }
 0x1ef   :  { %1345 = vmatmul.msk.f32.gmra.mxu1 %vm155_vm10, %v1592_v42 }
 0x1f0   :  { %147 = vperm.xlu2 %1434, %v102_v29  }
 0x1fd   :  { %v482_v37 = vpop.permute.xlu0 %481 }
 0x1fe   :  { %v486_v40 = vmul.f32 %v482_v37, %v471_v39 }
 0x200   :  { %491 = vrot.lane.b32.xlu0 %v486_v40, %s1595_s12 }
 0x23a   :  { %v490_v43 = vpop.permute.xlu2 %489 }
 0x23b   :  { %v1848_v44 = vadd.f32 %v490_v43, %v475_v41 }
 0x23d   :  { %1448 = vtanh.f32 %v1848_v44 }
 0x242   :  { %v142_v45 = vpop.permute.xlu2 %141 }
 0x243   :  { %v1449_v46 = vpop.eup %1448  ;;  %vm164_vm15 = vcmp.eq.s32.totalorder %v1757_v38, %v142_v45 }
 0x244   :  { %1354 = vmatmul.msk.f32.vlgmr.msra.gmra.mxu3 %vm164_vm15, %v1592_v42  ;;  %501 = vrot.lane.b32.xlu1 %v1449_v46, %s1594_s30 }
 0x245   :  { %640 = vmatpush.msra.mxu3 %v1785_v49 }
 0x247   :  { %641 = vmatpush.msra.mxu3 %v1790_v50 }
 0x249   :  { %642 = vmatpush.msra.mxu3 %v1797_v51 }
 0x24a   :  { %v148_v2 = vpop.permute.xlu2 %147 }
 0x24b   :  { %643 = vmatpush.msra.mxu3 %v1804_v52  ;;  %vm166_vm1 = vcmp.eq.s32.totalorder %v1757_v38, %v148_v2 }
 0x24c   :  { %144 = vperm.xlu1 %1433, %v101_v47  }
 0x264   :  { %v239_v48 = vpop.f32.mrf.mxu1 }
 0x265   :  { %1360 = vmatmul.msk.f32.gmra.mxu2 %vm289_vm4, %v239_v48 }
 0x26c   :  { %v242_v53 = vpop.f32.mrf.mxu1 }
 0x26d   :  { %1361 = vmatmul.msk.f32.gmra.mxu2 %vm289_vm4, %v242_v53 }
 0x272   :  { %v492_v55 = vpop.permute.xlu0 %491 }
 0x273   :  { %v1863_v58 = vadd.f32 %v492_v55, %v476_v54 }
 0x275   :  { %1450 = vtanh.f32 %v1863_v58 }
 0x27b   :  { %v1451_v60 = vpop.eup %1450 }
 0x27c   :  { %503 = vrot.lane.b32.xlu0 %v1451_v60, %s1594_s30 }
 0x284   :  { %150 = vperm.xlu0 %1432, %v103_v61  }
 0x2b6   :  { %v502_v62 = vpop.permute.xlu1 %501 }
 0x2b7   :  { %v507_v63 = vmul.f32 %v502_v62, %v456_v22 }
 0x2b9   :  { %511 = vrot.lane.b32.xlu1 %v507_v63, %s1595_s12 }
 0x2be   :  { %v145_v0 = vpop.permute.xlu1 %144 }
 0x2bf   :  { %vm165_vm0 = vcmp.eq.s32.totalorder %v1757_v38, %v145_v0 }
 0x2c0   :  { %1355 = vmatmul.msk.f32.gmra.mxu3 %vm165_vm0, %v1592_v42 }
 0x2c1   :  { %117 = vperm.xlu1 %1433, %v92_v1  }
 0x2c7   :  { %v1889_v9 = vpop.f32.mrf.mxu3 }
 0x2c8   :  { %1356 = vmatmul.msk.f32.gmra.mxu3 %vm166_vm1, %v1592_v42 }
 0x2e8   :  { %v361_v13 = vpop.f32.mrf.mxu2 }
 0x2e9   :  { %v362_v14 = vadd.f32 %v1827_v59, %v361_v13 }
 0x2ee   :  { %v504_v3 = vpop.permute.xlu0 %503 }
 0x2ef   :  { %v508_v4 = vmul.f32 %v504_v3, %v471_v39 }
 0x2f0   :  { %v364_v20 = vpop.f32.mrf.mxu2 }
 0x2f1   :  { %513 = vrot.lane.b32.xlu2 %v508_v4, %s1595_s12  ;;  %v365_v21 = vadd.f32 %v1827_v59, %v364_v20 }
 0x2f6   :  { %v151_v5 = vpop.permute.xlu0 %150 }
 0x2f7   :  { %vm167_vm2 = vcmp.eq.s32.totalorder %v1757_v38, %v151_v5 }
 0x2f8   :  { %1357 = vmatmul.msk.f32.gmra.mxu3 %vm167_vm2, %v1592_v42 }
 0x32b   :  { %v512_v6 = vpop.permute.xlu1 %511 }
 0x32c   :  { %1376 = vmatmul.msk.f32.vlgmr.msrb.gmra.mxu3 %vm289_vm4, %v512_v6 }
 0x32d   :  { %858 = vmatpush.msrb.mxu3 %v1785_v49 }
 0x32f   :  { %859 = vmatpush.msrb.mxu3 %v1790_v50 }
 0x331   :  { %860 = vmatpush.msrb.mxu3 %v1797_v51 }
 0x333   :  { %v118_v7 = vpop.permute.xlu1 %117  ;;  %861 = vmatpush.msrb.mxu3 %v1804_v52 }
 0x334   :  { %vm156_vm3 = vcmp.eq.s32.totalorder %v1757_v38, %v118_v7 }
 0x335   :  { %1346 = vmatmul.msk.f32.gmra.mxu1 %vm156_vm3, %v1592_v42 }
 0x343   :  { %v1891_v10 = vpop.f32.mrf.mxu3 }
 0x34b   :  { %v514_v8 = vpop.permute.xlu2 %513  ;;  %v1893_v11 = vpop.f32.mrf.mxu3 }
 0x34c   :  { %1377 = vmatmul.msk.f32.gmra.mxu3 %vm289_vm4, %v514_v8  ;;  %v94_v8 = vld [vmem:[%s2117_s1 + $0x30] sm:$0xff] }
 0x37b   :  { %v1895_v12 = vpop.f32.mrf.mxu3 }
 0x3af   :  { %v536_v15 = vpop.f32.mrf.mxu3 }
 0x3b0   :  { %v542_v16 = vadd.f32 %v536_v15, %v362_v14 }
 0x3b2   :  { %1452 = vtanh.f32 %v542_v16  ;;  %v245_v17 = vpop.f32.mrf.mxu1  ;;  %v1378_v25 = vmul.f32 -1.442695, %v542_v16 }
 0x3b3   :  { %1362 = vmatmul.msk.f32.gmra.mxu2 %vm289_vm4, %v245_v17 }
 0x3b8   :  { %v1453_v18 = vpop.eup %1452 }
 0x3b9   :  { %588 = vrot.lane.b32.xlu0 %v1453_v18, %s1594_s30  ;;  %v95_v18 = vld [vmem:[%s2117_s1 + $0x38] sm:$0xff] }
 0x3c1   :  { %120 = vperm.xlu0 %1432, %v93_v19  }
 0x3cf   :  { %v539_v22 = vpop.f32.mrf.mxu3 }
 0x3d0   :  { %v543_v23 = vadd.f32 %v539_v22, %v365_v21 }
 0x3d2   :  { %1454 = vtanh.f32 %v543_v23  ;;  %v1379_v26 = vmul.f32 -1.442695, %v543_v23 }
 0x3d3   :  { %1456 = vpow2.f32 %v1378_v25 }
 0x3d4   :  { %1458 = vpow2.f32 %v1379_v26 }
 0x3d8   :  { %v1455_v24 = vpop.eup %1454 }
 0x3d9   :  { %590 = vrot.lane.b32.xlu2 %v1455_v24, %s1594_s30  ;;  %v1457_v27 = vpop.eup %1456 }
 0x3da   :  { %v550_v28 = vadd.f32 1.0, %v1457_v27  ;;  %v1459_v29 = vpop.eup %1458 }
 0x3db   :  { %v551_v30 = vadd.f32 1.0, %v1459_v29 }
 0x3dc   :  { %1460 = vrcp.f32 %v550_v28  ;;  %v563_v40 = vand.u32 2147483648, %v550_v28  ;;  %vm557_vm6 = vweird.f32 %v550_v28  ;;  %v561_v41 = vand.u32 2147483647, %v550_v28 }
 0x3dd   :  { %1462 = vrcp.f32 %v551_v30  ;;  %v578_v55 = vand.u32 2147483648, %v551_v30  ;;  %vm572_vm10 = vweird.f32 %v551_v30  ;;  %v576_v60 = vand.u32 2147483647, %v551_v30 }
 0x3de   :  { %v564_v46 = vor.u32 1.1754944e-38, %v563_v40  ;;  %vm562_vm8 = vcmp.eq.f32.partialorder %v561_v41, 8.507059e+37 }
 0x3df   :  { %v579_v62 = vor.u32 1.1754944e-38, %v578_v55  ;;  %vm577_vm12 = vcmp.eq.f32.partialorder %v576_v60, 8.507059e+37 }
 0x3e2   :  { %v1461_v31 = vpop.eup %1460 }
 0x3e3   :  { %v553_v32 = vmul.f32 %v1461_v31, %v550_v28  ;;  %v1463_v34 = vpop.eup %1462  ;;  %vm558_vm5 = vweird.f32 %v1461_v31 }
 0x3e4   :  { %v568_v36 = vmul.f32 %v1463_v34, %v551_v30  ;;  %vm559_vm7 = vmor %vm557_vm6, %vm558_vm5  ;;  %vm573_vm9 = vweird.f32 %v1463_v34 }
 0x3e5   :  { %v554_v33 = vsub.f32 1.0, %v553_v32  ;;  %vm574_vm11 = vmor %vm572_vm10, %vm573_vm9 }
 0x3e6   :  { %v569_v39 = vsub.f32 1.0, %v568_v36 }
 0x3e7   :  { %v555_v35 = vmul.f32 %v1461_v31, %v554_v33 }
 0x3e8   :  { %v570_v45 = vmul.f32 %v1463_v34, %v569_v39 }
 0x3e9   :  { %v556_v37 = vadd.f32 %v1461_v31, %v555_v35 }
 0x3ea   :  { %v571_v54 = vadd.f32 %v1463_v34, %v570_v45 }
 0x3eb   :  { %v560_v43 = vsel %vm559_vm7, %v1461_v31, %v556_v37 }
 0x3ec   :  { %v565_v48 = vsel %vm562_vm8, %v564_v46, %v560_v43  ;;  %v575_v61 = vsel %vm574_vm11, %v1463_v34, %v571_v54 }
 0x3ed   :  { %v580_v1 = vsel %vm577_vm12, %v579_v62, %v575_v61  ;;  %v584_v7 = vmul.f32 %v565_v48, %v1848_v44 }
 0x3ee   :  { %v585_v3 = vmul.f32 %v580_v1, %v1863_v58 }
 0x42b   :  { %v589_v47 = vpop.permute.xlu0 %588 }
 0x42c   :  { %v594_v53 = vmul.f32 %v589_v47, %v565_v48 }
 0x42e   :  { %598 = vrot.lane.b32.xlu1 %v594_v53, %s1595_s12 }
 0x433   :  { %v121_v63 = vpop.permute.xlu0 %120  ;;  %v591_v0 = vpop.permute.xlu2 %590 }
 0x434   :  { %vm157_vm13 = vcmp.eq.s32.totalorder %v1757_v38, %v121_v63  ;;  %v595_v2 = vmul.f32 %v591_v0, %v580_v1 }
 0x435   :  { %1347 = vmatmul.msk.f32.gmra.mxu1 %vm157_vm13, %v1592_v42 }
 0x436   :  { %600 = vrot.lane.b32.xlu2 %v595_v2, %s1595_s12  ;;  %v367_v25 = vpop.f32.mrf.mxu2 }
 0x437   :  { %v368_v26 = vadd.f32 %v1827_v59, %v367_v25 }
 0x490   :  { %v601_v4 = vpop.permute.xlu2 %600 }
 0x491   :  { %v1910_v5 = vadd.f32 %v601_v4, %v585_v3 }
 0x493   :  { %1464 = vtanh.f32 %v1910_v5 }
 0x499   :  { %v1465_v6 = vpop.eup %1464 }
 0x49a   :  { %612 = vrot.lane.b32.xlu1 %v1465_v6, %s1594_s30 }
 0x4a0   :  { %v599_v13 = vpop.permute.xlu1 %598 }
 0x4a1   :  { %v1918_v14 = vadd.f32 %v599_v13, %v584_v7 }
 0x4a2   :  { %123 = vperm.xlu1 %1433, %v94_v8  }
 0x4a3   :  { %1466 = vtanh.f32 %v1918_v14 }
 0x4a9   :  { %v1467_v58 = vpop.eup %1466 }
 0x4aa   :  { %610 = vrot.lane.b32.xlu0 %v1467_v58, %s1594_s30 }
 0x4b2   :  { %v248_v15 = vpop.f32.mrf.mxu1 }
 0x4b3   :  { %1363 = vmatmul.msk.f32.gmra.mxu2 %vm289_vm4, %v248_v15 }
 0x50c   :  { %v613_v16 = vpop.permute.xlu1 %612 }
 0x50d   :  { %v617_v17 = vmul.f32 %v613_v16, %v580_v1 }
 0x50f   :  { %622 = vrot.lane.b32.xlu0 %v617_v17, %s1595_s12 }
 0x514   :  { %v124_v44 = vpop.permute.xlu1 %123 }
 0x515   :  { %vm158_vm14 = vcmp.eq.s32.totalorder %v1757_v38, %v124_v44 }
 0x516   :  { %1348 = vmatmul.msk.f32.gmra.mxu1 %vm158_vm14, %v1592_v42 }
 0x517   :  { %126 = vperm.xlu0 %1432, %v95_v18  }
 0x51c   :  { %v611_v19 = vpop.permute.xlu0 %610 }
 0x51d   :  { %v616_v20 = vmul.f32 %v611_v19, %v565_v48 }
 0x51f   :  { %620 = vrot.lane.b32.xlu2 %v616_v20, %s1595_s12 }
 0x536   :  { %v370_v29 = vpop.f32.mrf.mxu2 }
 0x537   :  { %v371_v30 = vadd.f32 %v1827_v59, %v370_v29 }
 0x579   :  { %v621_v21 = vpop.permute.xlu2 %620 }
 0x57a   :  { %1380 = vmatmul.msk.f32.vlgmr.msra.gmra.mxu3 %vm289_vm4, %v621_v21 }
 0x57b   :  { %1076 = vmatpush.msra.mxu3 %v1785_v49 }
 0x57d   :  { %1077 = vmatpush.msra.mxu3 %v1790_v50 }
 0x57f   :  { %1078 = vmatpush.msra.mxu3 %v1797_v51 }
 0x581   :  { %v623_v22 = vpop.permute.xlu0 %622  ;;  %1079 = vmatpush.msra.mxu3 %v1804_v52 }
 0x582   :  { %1381 = vmatmul.msk.f32.gmra.mxu3 %vm289_vm4, %v623_v22 }
 0x589   :  { %v127_v23 = vpop.permute.xlu0 %126 }
 0x58a   :  { %vm159_vm15 = vcmp.eq.s32.totalorder %v1757_v38, %v127_v23 }
 0x58b   :  { %1349 = vmatmul.msk.f32.gmra.mxu1 %vm159_vm15, %v1592_v42 }
 0x593   :  { %v251_v24 = vpop.f32.mrf.mxu1 }
 0x594   :  { %1364 = vmatmul.msk.f32.gmra.mxu2 %vm289_vm4, %v251_v24 }
 0x5fd   :  { %v645_v27 = vpop.f32.mrf.mxu3 }
 0x5fe   :  { %v651_v28 = vadd.f32 %v645_v27, %v368_v26  ;;  %v96_v26 = vld [vmem:[%s2117_s1 + $0x40] sm:$0xff] }
 0x600   :  { %1468 = vtanh.f32 %v651_v28  ;;  %v1382_v36 = vmul.f32 -1.442695, %v651_v28 }
 0x605   :  { %v648_v31 = vpop.f32.mrf.mxu3 }
 0x606   :  { %v1469_v32 = vpop.eup %1468  ;;  %v652_v33 = vadd.f32 %v648_v31, %v371_v30 }
 0x607   :  { %697 = vrot.lane.b32.xlu2 %v1469_v32, %s1594_s30 }
 0x608   :  { %1470 = vtanh.f32 %v652_v33  ;;  %v254_v34 = vpop.f32.mrf.mxu1  ;;  %v1383_v45 = vmul.f32 -1.442695, %v652_v33 }
 0x609   :  { %1365 = vmatmul.msk.f32.gmra.mxu2 %vm289_vm4, %v254_v34  ;;  %1472 = vpow2.f32 %v1382_v36 }
 0x60e   :  { %v1471_v35 = vpop.eup %1470 }
 0x60f   :  { %699 = vrot.lane.b32.xlu1 %v1471_v35, %s1594_s30  ;;  %v1473_v37 = vpop.eup %1472 }
 0x610   :  { %v659_v39 = vadd.f32 1.0, %v1473_v37 }
 0x612   :  { %1474 = vrcp.f32 %v659_v39  ;;  %v672_v48 = vand.u32 2147483648, %v659_v39  ;;  %vm666_vm1 = vweird.f32 %v659_v39  ;;  %v670_v53 = vand.u32 2147483647, %v659_v39 }
 0x613   :  { %1476 = vpow2.f32 %v1383_v45 }
 0x614   :  { %v673_v60 = vor.u32 1.1754944e-38, %v672_v48  ;;  %vm671_vm3 = vcmp.eq.f32.partialorder %v670_v53, 8.507059e+37 }
 0x617   :  { %v373_v31 = vpop.f32.mrf.mxu2 }
 0x618   :  { %v1475_v40 = vpop.eup %1474  ;;  %v374_v32 = vadd.f32 %v1827_v59, %v373_v31 }
 0x619   :  { %v662_v41 = vmul.f32 %v1475_v40, %v659_v39  ;;  %vm667_vm0 = vweird.f32 %v1475_v40  ;;  %v1477_v54 = vpop.eup %1476 }
 0x61a   :  { %vm668_vm2 = vmor %vm666_vm1, %vm667_vm0  ;;  %v660_v61 = vadd.f32 1.0, %v1477_v54 }
 0x61b   :  { %v663_v43 = vsub.f32 1.0, %v662_v41 }
 0x61c   :  { %1478 = vrcp.f32 %v660_v61  ;;  %v687_v7 = vand.u32 2147483648, %v660_v61  ;;  %vm681_vm6 = vweird.f32 %v660_v61  ;;  %v685_v8 = vand.u32 2147483647, %v660_v61 }
 0x61d   :  { %v664_v46 = vmul.f32 %v1475_v40, %v663_v43 }
 0x61e   :  { %v688_v58 = vor.u32 1.1754944e-38, %v687_v7  ;;  %vm686_vm8 = vcmp.eq.f32.partialorder %v685_v8, 8.507059e+37 }
 0x61f   :  { %v665_v47 = vadd.f32 %v1475_v40, %v664_v46 }
 0x621   :  { %v669_v55 = vsel %vm668_vm2, %v1475_v40, %v665_v47 }
 0x622   :  { %v674_v63 = vsel %vm671_vm3, %v673_v60, %v669_v55  ;;  %v1479_v1 = vpop.eup %1478 }
 0x623   :  { %v677_v2 = vmul.f32 %v1479_v1, %v660_v61  ;;  %vm682_vm5 = vweird.f32 %v1479_v1  ;;  %v693_v44 = vmul.f32 %v674_v63, %v1918_v14 }
 0x624   :  { %vm683_vm7 = vmor %vm681_vm6, %vm682_vm5 }
 0x625   :  { %v678_v3 = vsub.f32 1.0, %v677_v2 }
 0x627   :  { %v679_v4 = vmul.f32 %v1479_v1, %v678_v3 }
 0x629   :  { %v680_v6 = vadd.f32 %v1479_v1, %v679_v4 }
 0x62b   :  { %v684_v13 = vsel %vm683_vm7, %v1479_v1, %v680_v6 }
 0x62c   :  { %v689_v15 = vsel %vm686_vm8, %v688_v58, %v684_v13 }
 0x62d   :  { %v694_v21 = vmul.f32 %v689_v15, %v1910_v5 }
 0x661   :  { %v698_v62 = vpop.permute.xlu2 %697 }
 0x662   :  { %v703_v0 = vmul.f32 %v698_v62, %v674_v63 }
 0x664   :  { %707 = vrot.lane.b32.xlu2 %v703_v0, %s1595_s12 }
 0x681   :  { %v700_v16 = vpop.permute.xlu1 %699 }
 0x682   :  { %v704_v17 = vmul.f32 %v700_v16, %v689_v15 }
 0x684   :  { %709 = vrot.lane.b32.xlu0 %v704_v17, %s1595_s12 }
 0x6be   :  { %v708_v18 = vpop.permute.xlu2 %707 }
 0x6bf   :  { %v1947_v19 = vadd.f32 %v708_v18, %v693_v44 }
 0x6c1   :  { %1480 = vtanh.f32 %v1947_v19 }
 0x6c7   :  { %v1481_v20 = vpop.eup %1480 }
 0x6c8   :  { %719 = vrot.lane.b32.xlu1 %v1481_v20, %s1594_s30 }
 0x6f6   :  { %v710_v22 = vpop.permute.xlu0 %709 }
 0x6f7   :  { %v1952_v23 = vadd.f32 %v710_v22, %v694_v21 }
 0x6f9   :  { %1482 = vtanh.f32 %v1952_v23 }
 0x6ff   :  { %v1483_v24 = vpop.eup %1482 }
 0x700   :  { %721 = vrot.lane.b32.xlu2 %v1483_v24, %s1594_s30 }
 0x73a   :  { %v720_v25 = vpop.permute.xlu1 %719 }
 0x73b   :  { %v725_v14 = vmul.f32 %v720_v25, %v674_v63 }
 0x73d   :  { %729 = vrot.lane.b32.xlu0 %v725_v14, %s1595_s12 }
 0x745   :  { %129 = vperm.xlu0 %1432, %v96_v26  }
 0x75a   :  { %v722_v27 = vpop.permute.xlu2 %721 }
 0x75b   :  { %v726_v28 = vmul.f32 %v722_v27, %v689_v15 }
 0x75d   :  { %731 = vrot.lane.b32.xlu1 %v726_v28, %s1595_s12 }
 0x7af   :  { %v730_v5 = vpop.permute.xlu0 %729 }
 0x7b0   :  { %1384 = vmatmul.msk.f32.vlgmr.msrb.gmra.mxu0 %vm289_vm4, %v730_v5 }
 0x7b1   :  { %1185 = vmatpush.msrb.mxu0 %v1785_v49 }
 0x7b3   :  { %1186 = vmatpush.msrb.mxu0 %v1790_v50 }
 0x7b5   :  { %1187 = vmatpush.msrb.mxu0 %v1797_v51  ;;  %v97_v51 = vld [vmem:[%s2117_s1 + $0x48] sm:$0xff] }
 0x7b7   :  { %v130_v29 = vpop.permute.xlu0 %129  ;;  %1188 = vmatpush.msrb.mxu0 %v1804_v52  ;;  %v376_v52 = vpop.f32.mrf.mxu2 }
 0x7b8   :  { %vm160_vm9 = vcmp.eq.s32.totalorder %v1757_v38, %v130_v29  ;;  %v377_v35 = vadd.f32 %v1827_v59, %v376_v52 }
 0x7b9   :  { %1350 = vmatmul.msk.f32.gmra.mxu1 %vm160_vm9, %v1592_v42 }
 0x7cf   :  { %v732_v30 = vpop.permute.xlu1 %731 }
 0x7d0   :  { %1385 = vmatmul.msk.f32.gmra.mxu0 %vm289_vm4, %v732_v30 }
 0x82d   :  { %v754_v33 = vpop.f32.mrf.mxu0 }
 0x82e   :  { %v760_v34 = vadd.f32 %v754_v33, %v374_v32 }
 0x830   :  { %1484 = vtanh.f32 %v760_v34  ;;  %v1386_v40 = vmul.f32 -1.442695, %v760_v34  ;;  %v99_v34 = vld [vmem:[%s2117_s1 + $0x58] sm:$0xff] }
 0x836   :  { %v1485_v49 = vpop.eup %1484  ;;  %v257_v50 = vpop.f32.mrf.mxu1 }
 0x837   :  { %806 = vrot.lane.b32.xlu2 %v1485_v49, %s1594_s30  ;;  %1366 = vmatmul.msk.f32.gmra.mxu2 %vm289_vm4, %v257_v50 }
 0x83f   :  { %132 = vperm.xlu2 %1434, %v97_v51  }
 0x84d   :  { %v757_v36 = vpop.f32.mrf.mxu0 }
 0x84e   :  { %v761_v37 = vadd.f32 %v757_v36, %v377_v35 }
 0x850   :  { %1486 = vtanh.f32 %v761_v37  ;;  %v1387_v2 = vmul.f32 -1.442695, %v761_v37 }
 0x851   :  { %1488 = vpow2.f32 %v1386_v40 }
 0x856   :  { %v1487_v39 = vpop.eup %1486 }
 0x857   :  { %808 = vrot.lane.b32.xlu1 %v1487_v39, %s1594_s30  ;;  %v1489_v41 = vpop.eup %1488 }
 0x858   :  { %v768_v43 = vadd.f32 1.0, %v1489_v41 }
 0x85a   :  { %1490 = vrcp.f32 %v768_v43  ;;  %v781_v54 = vand.u32 2147483648, %v768_v43  ;;  %vm775_vm11 = vweird.f32 %v768_v43  ;;  %v779_v55 = vand.u32 2147483647, %v768_v43 }
 0x85b   :  { %1492 = vpow2.f32 %v1387_v2 }
 0x85c   :  { %v782_v61 = vor.u32 1.1754944e-38, %v781_v54  ;;  %vm780_vm13 = vcmp.eq.f32.partialorder %v779_v55, 8.507059e+37 }
 0x860   :  { %v1491_v45 = vpop.eup %1490 }
 0x861   :  { %v771_v46 = vmul.f32 %v1491_v45, %v768_v43  ;;  %vm776_vm10 = vweird.f32 %v1491_v45  ;;  %v1493_v3 = vpop.eup %1492 }
 0x862   :  { %vm777_vm12 = vmor %vm775_vm11, %vm776_vm10  ;;  %v769_v4 = vadd.f32 1.0, %v1493_v3 }
 0x863   :  { %v772_v47 = vsub.f32 1.0, %v771_v46 }
 0x864   :  { %1494 = vrcp.f32 %v769_v4  ;;  %v796_v15 = vand.u32 2147483648, %v769_v4  ;;  %vm790_vm0 = vweird.f32 %v769_v4  ;;  %v794_v16 = vand.u32 2147483647, %v769_v4 }
 0x865   :  { %v773_v48 = vmul.f32 %v1491_v45, %v772_v47 }
 0x866   :  { %v797_v44 = vor.u32 1.1754944e-38, %v796_v15  ;;  %vm795_vm2 = vcmp.eq.f32.partialorder %v794_v16, 8.507059e+37 }
 0x867   :  { %v774_v53 = vadd.f32 %v1491_v45, %v773_v48 }
 0x869   :  { %v778_v60 = vsel %vm777_vm12, %v1491_v45, %v774_v53 }
 0x86a   :  { %v783_v63 = vsel %vm780_vm13, %v782_v61, %v778_v60  ;;  %v1495_v6 = vpop.eup %1494 }
 0x86b   :  { %v786_v7 = vmul.f32 %v1495_v6, %v769_v4  ;;  %vm791_vm15 = vweird.f32 %v1495_v6  ;;  %v802_v22 = vmul.f32 %v783_v63, %v1947_v19  ;;  %v98_v19 = vld [vmem:[%s2117_s1 + $0x50] sm:$0xff] }
 0x86c   :  { %vm792_vm1 = vmor %vm790_vm0, %vm791_vm15 }
 0x86d   :  { %v787_v8 = vsub.f32 1.0, %v786_v7 }
 0x86f   :  { %v788_v13 = vmul.f32 %v1495_v6, %v787_v8 }
 0x871   :  { %v789_v58 = vadd.f32 %v1495_v6, %v788_v13 }
 0x873   :  { %v793_v17 = vsel %vm792_vm1, %v1495_v6, %v789_v58 }
 0x874   :  { %v798_v20 = vsel %vm795_vm2, %v797_v44, %v793_v17 }
 0x875   :  { %v803_v27 = vmul.f32 %v798_v20, %v1952_v23 }
 0x891   :  { %v807_v62 = vpop.permute.xlu2 %806 }
 0x892   :  { %v812_v0 = vmul.f32 %v807_v62, %v783_v63 }
 0x894   :  { %816 = vrot.lane.b32.xlu0 %v812_v0, %s1595_s12 }
 0x899   :  { %v133_v1 = vpop.permute.xlu2 %132 }
 0x89a   :  { %vm161_vm14 = vcmp.eq.s32.totalorder %v1757_v38, %v133_v1 }
 0x89b   :  { %1351 = vmatmul.msk.f32.gmra.mxu1 %vm161_vm14, %v1592_v42 }
 0x8ba   :  { %v379_v35 = vpop.f32.mrf.mxu2 }
 0x8bb   :  { %v380_v36 = vadd.f32 %v1827_v59, %v379_v35 }
 0x8c9   :  { %v809_v18 = vpop.permute.xlu1 %808 }
 0x8ca   :  { %v813_v21 = vmul.f32 %v809_v18, %v798_v20 }
 0x8cc   :  { %818 = vrot.lane.b32.xlu1 %v813_v21, %s1595_s12 }
 0x906   :  { %v817_v24 = vpop.permute.xlu0 %816 }
 0x907   :  { %v1982_v25 = vadd.f32 %v817_v24, %v802_v22 }
 0x909   :  { %1496 = vtanh.f32 %v1982_v25 }
 0x90f   :  { %v1497_v14 = vpop.eup %1496 }
 0x910   :  { %828 = vrot.lane.b32.xlu2 %v1497_v14, %s1594_s30 }
 0x918   :  { %v260_v26 = vpop.f32.mrf.mxu1 }
 0x919   :  { %1367 = vmatmul.msk.f32.gmra.mxu2 %vm289_vm4, %v260_v26 }
 0x93e   :  { %v819_v28 = vpop.permute.xlu1 %818 }
 0x93f   :  { %v1988_v5 = vadd.f32 %v819_v28, %v803_v27 }
 0x941   :  { %1498 = vtanh.f32 %v1988_v5 }
 0x947   :  { %v1499_v29 = vpop.eup %1498 }
 0x948   :  { %830 = vrot.lane.b32.xlu0 %v1499_v29, %s1594_s30 }
 0x950   :  { %135 = vperm.xlu0 %1432, %v98_v19  }
 0x96a   :  { %v829_v30 = vpop.permute.xlu2 %828 }
 0x96b   :  { %v834_v31 = vmul.f32 %v829_v30, %v783_v63 }
 0x96d   :  { %838 = vrot.lane.b32.xlu1 %v834_v31, %s1595_s12 }
 0x99c   :  { %v382_v41 = vpop.f32.mrf.mxu2 }
 0x99d   :  { %v383_v43 = vadd.f32 %v1827_v59, %v382_v41 }
 0x9ba   :  { %v831_v32 = vpop.permute.xlu0 %830 }
 0x9bb   :  { %v835_v33 = vmul.f32 %v831_v32, %v798_v20 }
 0x9bd   :  { %840 = vrot.lane.b32.xlu2 %v835_v33, %s1595_s12 }
 0x9c2   :  { %v136_v23 = vpop.permute.xlu0 %135 }
 0x9c3   :  { %vm162_vm3 = vcmp.eq.s32.totalorder %v1757_v38, %v136_v23  ;;  %v2039_v23 = vld [vmem:[%s2122_s6] ss:$0 sm:$0xff] }
 0x9c4   :  { %1352 = vmatmul.msk.f32.gmra.mxu1 %vm162_vm3, %v1592_v42 }
 0x9c5   :  { %138 = vperm.xlu2 %1434, %v99_v34  }
 0x9df   :  { %v839_v49 = vpop.permute.xlu1 %838 }
 0x9e0   :  { %1388 = vmatmul.msk.f32.vlgmr.msrb.gmra.mxu3 %vm289_vm4, %v839_v49 }
 0xa17   :  { %v841_v50 = vpop.permute.xlu2 %840 }
 0xa18   :  { %1389 = vmatmul.msk.f32.gmra.mxu3 %vm289_vm4, %v841_v50 }
 0xa1f   :  { %v139_v51 = vpop.permute.xlu2 %138 }
 0xa20   :  { %vm163_vm5 = vcmp.eq.s32.totalorder %v1757_v38, %v139_v51 }
 0xa21   :  { %1353 = vmatmul.msk.f32.gmra.mxu1 %vm163_vm5, %v1592_v42 }
 0xa41   :  { %v263_v52 = vpop.f32.mrf.mxu1 }
 0xa42   :  { %1368 = vmatmul.msk.f32.gmra.mxu2 %vm289_vm4, %v263_v52 }
 0xa63   :  { %v863_v37 = vpop.f32.mrf.mxu3 }
 0xa64   :  { %v869_v39 = vadd.f32 %v863_v37, %v380_v36 }
 0xa66   :  { %1500 = vtanh.f32 %v869_v39  ;;  %v1390_v47 = vmul.f32 -1.442695, %v869_v39 }
 0xa6c   :  { %v1501_v40 = vpop.eup %1500 }
 0xa6d   :  { %915 = vrot.lane.b32.xlu1 %v1501_v40, %s1594_s30 }
 0xa9b   :  { %v866_v45 = vpop.f32.mrf.mxu3 }
 0xa9c   :  { %v870_v46 = vadd.f32 %v866_v45, %v383_v43 }
 0xa9e   :  { %1502 = vtanh.f32 %v870_v46  ;;  %v266_v38 = vpop.f32.mrf.mxu1 }
 0xa9f   :  { %1369 = vmatmul.msk.f32.gmra.mxu2 %vm289_vm4, %v266_v38  ;;  %1504 = vpow2.f32 %v1390_v47 }
 0xaa4   :  { %v1503_v42 = vpop.eup %1502 }
 0xaa5   :  { %917 = vrot.lane.b32.xlu0 %v1503_v42, %s1594_s30  ;;  %v1505_v59 = vpop.eup %1504 }
 0xaa6   :  { %v877_v48 = vadd.f32 1.0, %v1505_v59 }
 0xaa7   :  { %1370 = vmatmul.msk.f32.gmra.mxu2 %vm289_vm4, %v1889_v9 }
 0xaa8   :  { %1506 = vrcp.f32 %v877_v48  ;;  %v890_v9 = vand.u32 2147483648, %v877_v48  ;;  %vm884_vm7 = vweird.f32 %v877_v48 }
 0xaaa   :  { %v891_v63 = vor.u32 1.1754944e-38, %v890_v9 }
 0xaae   :  { %v1507_v53 = vpop.eup %1506 }
 0xaaf   :  { %1371 = vmatmul.msk.f32.gmra.mxu2 %vm289_vm4, %v1891_v10  ;;  %v880_v54 = vmul.f32 %v1507_v53, %v877_v48  ;;  %vm885_vm6 = vweird.f32 %v1507_v53  ;;  %v888_v10 = vand.u32 2147483647, %v877_v48 }
 0xab0   :  { %vm886_vm8 = vmor %vm884_vm7, %vm885_vm6 }
 0xab1   :  { %v881_v55 = vsub.f32 1.0, %v880_v54  ;;  %vm889_vm9 = vcmp.eq.f32.partialorder %v888_v10, 8.507059e+37 }
 0xab3   :  { %v882_v60 = vmul.f32 %v1507_v53, %v881_v55 }
 0xab5   :  { %v883_v61 = vadd.f32 %v1507_v53, %v882_v60 }
 0xab7   :  { %1372 = vmatmul.msk.f32.gmra.mxu2 %vm289_vm4, %v1893_v11  ;;  %v887_v62 = vsel %vm886_vm8, %v1507_v53, %v883_v61 }
 0xab8   :  { %v892_v0 = vsel %vm889_vm9, %v891_v63, %v887_v62 }
 0xab9   :  { %v911_v21 = vmul.f32 %v892_v0, %v1982_v25 }
 0xabf   :  { %1373 = vmatmul.msk.f32.gmra.mxu2 %vm289_vm4, %v1895_v12  ;;  %v1391_v12 = vmul.f32 -1.442695, %v870_v46 }
 0xac1   :  { %1508 = vpow2.f32 %v1391_v12 }
 0xac5   :  { %v385_v33 = vpop.f32.mrf.mxu2 }
 0xac6   :  { %v386_v34 = vadd.f32 %v2039_v23, %v385_v33 }
 0xac7   :  { %v1509_v2 = vpop.eup %1508 }
 0xac8   :  { %v878_v3 = vadd.f32 1.0, %v1509_v2 }
 0xaca   :  { %1510 = vrcp.f32 %v878_v3  ;;  %v905_v58 = vand.u32 2147483648, %v878_v3  ;;  %vm899_vm11 = vweird.f32 %v878_v3  ;;  %v903_v15 = vand.u32 2147483647, %v878_v3 }
 0xacc   :  { %v906_v17 = vor.u32 1.1754944e-38, %v905_v58  ;;  %vm904_vm13 = vcmp.eq.f32.partialorder %v903_v15, 8.507059e+37 }
 0xad0   :  { %v1511_v4 = vpop.eup %1510 }
 0xad1   :  { %v895_v6 = vmul.f32 %v1511_v4, %v878_v3  ;;  %vm900_vm10 = vweird.f32 %v1511_v4 }
 0xad2   :  { %vm901_vm12 = vmor %vm899_vm11, %vm900_vm10 }
 0xad3   :  { %v896_v7 = vsub.f32 1.0, %v895_v6 }
 0xad5   :  { %v897_v8 = vmul.f32 %v1511_v4, %v896_v7 }
 0xad7   :  { %v898_v13 = vadd.f32 %v1511_v4, %v897_v8 }
 0xad9   :  { %v902_v16 = vsel %vm901_vm12, %v1511_v4, %v898_v13 }
 0xada   :  { %v907_v44 = vsel %vm904_vm13, %v906_v17, %v902_v16 }
 0xadb   :  { %v912_v26 = vmul.f32 %v907_v44, %v1988_v5 }
 0xadf   :  { %v916_v11 = vpop.permute.xlu1 %915 }
 0xae0   :  { %v921_v1 = vmul.f32 %v916_v11, %v892_v0 }
 0xae2   :  { %925 = vrot.lane.b32.xlu1 %v921_v1, %s1595_s12 }
 0xb17   :  { %v918_v18 = vpop.permute.xlu0 %917 }
 0xb18   :  { %v922_v20 = vmul.f32 %v918_v18, %v907_v44 }
 0xb1a   :  { %927 = vrot.lane.b32.xlu2 %v922_v20, %s1595_s12 }
 0xb22   :  { %v388_v52 = vpop.f32.mrf.mxu2 }
 0xb23   :  { %v389_v35 = vadd.f32 %v2039_v23, %v388_v52 }
 0xb54   :  { %v926_v22 = vpop.permute.xlu1 %925 }
 0xb55   :  { %v2023_v24 = vadd.f32 %v926_v22, %v911_v21 }
 0xb57   :  { %1512 = vtanh.f32 %v2023_v24 }
 0xb5d   :  { %v1513_v14 = vpop.eup %1512 }
 0xb5e   :  { %937 = vrot.lane.b32.xlu0 %v1513_v14, %s1594_s30 }
 0xb74   :  { %v928_v27 = vpop.permute.xlu2 %927 }
 0xb75   :  { %v2028_v28 = vadd.f32 %v928_v27, %v912_v26 }
 0xb77   :  { %1514 = vtanh.f32 %v2028_v28 }
 0xb7d   :  { %v1515_v29 = vpop.eup %1514 }
 0xb7e   :  { %939 = vrot.lane.b32.xlu1 %v1515_v29, %s1594_s30  ;;  %v391_v29 = vpop.f32.mrf.mxu2 }
 0xbd0   :  { %v938_v19 = vpop.permute.xlu0 %937 }
 0xbd1   :  { %v943_v25 = vmul.f32 %v938_v19, %v892_v0  ;;  %v392_v19 = vadd.f32 %v2039_v23, %v391_v29 }
 0xbd3   :  { %947 = vrot.lane.b32.xlu2 %v943_v25, %s1595_s12 }
 0xbf0   :  { %v940_v30 = vpop.permute.xlu1 %939 }
 0xbf1   :  { %v944_v31 = vmul.f32 %v940_v30, %v907_v44 }
 0xbf3   :  { %949 = vrot.lane.b32.xlu0 %v944_v31, %s1595_s12 }
 0xc2d   :  { %v948_v32 = vpop.permute.xlu2 %947 }
 0xc2e   :  { %1392 = vmatmul.msk.f32.vlgmr.msra.gmra.mxu0 %vm289_vm4, %v948_v32  ;;  %v394_v32 = vpop.f32.mrf.mxu2 }
 0xc65   :  { %v950_v5 = vpop.permute.xlu0 %949 }
 0xc66   :  { %1393 = vmatmul.msk.f32.gmra.mxu0 %vm289_vm4, %v950_v5  ;;  %v395_v5 = vadd.f32 %v2039_v23, %v394_v32 }
 0xcab   :  { %v972_v49 = vpop.f32.mrf.mxu0 }
 0xcac   :  { %v978_v50 = vadd.f32 %v972_v49, %v386_v34 }
 0xcae   :  { %1516 = vtanh.f32 %v978_v50  ;;  %v1394_v40 = vmul.f32 -1.442695, %v978_v50 }
 0xcb4   :  { %v1517_v51 = vpop.eup %1516 }
 0xcb5   :  { %1024 = vrot.lane.b32.xlu1 %v1517_v51, %s1594_s30 }
 0xce3   :  { %v975_v36 = vpop.f32.mrf.mxu0 }
 0xce4   :  { %v979_v37 = vadd.f32 %v975_v36, %v389_v35 }
 0xce6   :  { %1518 = vtanh.f32 %v979_v37  ;;  %v1395_v42 = vmul.f32 -1.442695, %v979_v37 }
 0xce7   :  { %1520 = vpow2.f32 %v1394_v40 }
 0xcec   :  { %v1519_v39 = vpop.eup %1518 }
 0xced   :  { %1026 = vrot.lane.b32.xlu2 %v1519_v39, %s1594_s30  ;;  %v1521_v41 = vpop.eup %1520 }
 0xcee   :  { %v986_v43 = vadd.f32 1.0, %v1521_v41 }
 0xcf0   :  { %1522 = vrcp.f32 %v986_v43  ;;  %v999_v48 = vand.u32 2147483648, %v986_v43  ;;  %vm993_vm15 = vweird.f32 %v986_v43  ;;  %v997_v53 = vand.u32 2147483647, %v986_v43 }
 0xcf1   :  { %1524 = vpow2.f32 %v1395_v42 }
 0xcf2   :  { %v1000_v60 = vor.u32 1.1754944e-38, %v999_v48  ;;  %vm998_vm1 = vcmp.eq.f32.partialorder %v997_v53, 8.507059e+37 }
 0xcf6   :  { %v1523_v45 = vpop.eup %1522 }
 0xcf7   :  { %v989_v46 = vmul.f32 %v1523_v45, %v986_v43  ;;  %vm994_vm14 = vweird.f32 %v1523_v45  ;;  %v1525_v54 = vpop.eup %1524 }
 0xcf8   :  { %vm995_vm0 = vmor %vm993_vm15, %vm994_vm14  ;;  %v987_v61 = vadd.f32 1.0, %v1525_v54 }
 0xcf9   :  { %v990_v38 = vsub.f32 1.0, %v989_v46 }
 0xcfa   :  { %1526 = vrcp.f32 %v987_v61  ;;  %v1014_v2 = vand.u32 2147483648, %v987_v61  ;;  %vm1008_vm3 = vweird.f32 %v987_v61  ;;  %v1012_v3 = vand.u32 2147483647, %v987_v61 }
 0xcfb   :  { %v991_v47 = vmul.f32 %v1523_v45, %v990_v38 }
 0xcfc   :  { %v1015_v6 = vor.u32 1.1754944e-38, %v1014_v2  ;;  %vm1013_vm6 = vcmp.eq.f32.partialorder %v1012_v3, 8.507059e+37 }
 0xcfd   :  { %v992_v59 = vadd.f32 %v1523_v45, %v991_v47 }
 0xcff   :  { %v996_v55 = vsel %vm995_vm0, %v1523_v45, %v992_v59 }
 0xd00   :  { %v1001_v10 = vsel %vm998_vm1, %v1000_v60, %v996_v55  ;;  %v1527_v63 = vpop.eup %1526 }
 0xd01   :  { %v1004_v11 = vmul.f32 %v1527_v63, %v987_v61  ;;  %vm1009_vm2 = vweird.f32 %v1527_v63  ;;  %v1020_v58 = vmul.f32 %v1001_v10, %v2023_v24 }
 0xd02   :  { %vm1010_vm5 = vmor %vm1008_vm3, %vm1009_vm2 }
 0xd03   :  { %v1005_v0 = vsub.f32 1.0, %v1004_v11 }
 0xd05   :  { %v1006_v1 = vmul.f32 %v1527_v63, %v1005_v0 }
 0xd07   :  { %v1007_v12 = vadd.f32 %v1527_v63, %v1006_v1 }
 0xd09   :  { %v1011_v4 = vsel %vm1010_vm5, %v1527_v63, %v1007_v12 }
 0xd0a   :  { %v1016_v8 = vsel %vm1013_vm6, %v1015_v6, %v1011_v4 }
 0xd0b   :  { %v1021_v44 = vmul.f32 %v1016_v8, %v2028_v28 }
 0xd27   :  { %v1025_v9 = vpop.permute.xlu1 %1024 }
 0xd28   :  { %v1030_v62 = vmul.f32 %v1025_v9, %v1001_v10 }
 0xd2a   :  { %1034 = vrot.lane.b32.xlu0 %v1030_v62, %s1595_s12 }
 0xd47   :  { %v1027_v7 = vpop.permute.xlu2 %1026 }
 0xd48   :  { %v1031_v13 = vmul.f32 %v1027_v7, %v1016_v8 }
 0xd4a   :  { %1036 = vrot.lane.b32.xlu1 %v1031_v13, %s1595_s12 }
 0xd9c   :  { %v1035_v15 = vpop.permute.xlu0 %1034 }
 0xd9d   :  { %v2048_v16 = vadd.f32 %v1035_v15, %v1020_v58 }
 0xd9f   :  { %1528 = vtanh.f32 %v2048_v16 }
 0xda5   :  { %v1529_v17 = vpop.eup %1528 }
 0xda6   :  { %1046 = vrot.lane.b32.xlu2 %v1529_v17, %s1594_s30 }
 0xdbc   :  { %v1037_v18 = vpop.permute.xlu1 %1036 }
 0xdbd   :  { %v2053_v20 = vadd.f32 %v1037_v18, %v1021_v44 }
 0xdbf   :  { %1530 = vtanh.f32 %v2053_v20 }
 0xdc5   :  { %v1531_v21 = vpop.eup %1530 }
 0xdc6   :  { %1048 = vrot.lane.b32.xlu0 %v1531_v21, %s1594_s30  ;;  %v397_v21 = vpop.f32.mrf.mxu2 }
 0xe00   :  { %v1047_v22 = vpop.permute.xlu2 %1046 }
 0xe01   :  { %v1052_v24 = vmul.f32 %v1047_v22, %v1001_v10  ;;  %v398_v22 = vadd.f32 %v2039_v23, %v397_v21 }
 0xe03   :  { %1056 = vrot.lane.b32.xlu1 %v1052_v24, %s1595_s12 }
 0xe38   :  { %v1049_v14 = vpop.permute.xlu0 %1048 }
 0xe39   :  { %v1053_v26 = vmul.f32 %v1049_v14, %v1016_v8 }
 0xe3b   :  { %1058 = vrot.lane.b32.xlu2 %v1053_v26, %s1595_s12 }
 0xe75   :  { %v1057_v27 = vpop.permute.xlu1 %1056 }
 0xe76   :  { %1396 = vmatmul.msk.f32.vlgmr.msra.gmra.mxu3 %vm289_vm4, %v1057_v27  ;;  %v400_v27 = vpop.f32.mrf.mxu2 }
 0xe95   :  { %v1059_v28 = vpop.permute.xlu2 %1058 }
 0xe96   :  { %1397 = vmatmul.msk.f32.gmra.mxu3 %vm289_vm4, %v1059_v28  ;;  %v401_v28 = vadd.f32 %v2039_v23, %v400_v27 }
 0xef9   :  { %v1081_v25 = vpop.f32.mrf.mxu3 }
 0xefa   :  { %v1087_v30 = vadd.f32 %v1081_v25, %v392_v19 }
 0xefc   :  { %1532 = vtanh.f32 %v1087_v30  ;;  %v1398_v50 = vmul.f32 -1.442695, %v1087_v30 }
 0xf02   :  { %v1533_v31 = vpop.eup %1532 }
 0xf03   :  { %1133 = vrot.lane.b32.xlu0 %v1533_v31, %s1594_s30 }
 0xf19   :  { %v1084_v33 = vpop.f32.mrf.mxu3 }
 0xf1a   :  { %v1088_v34 = vadd.f32 %v1084_v33, %v395_v5 }
 0xf1c   :  { %1534 = vtanh.f32 %v1088_v34  ;;  %v1399_v39 = vmul.f32 -1.442695, %v1088_v34 }
 0xf1d   :  { %1536 = vpow2.f32 %v1398_v50 }
 0xf22   :  { %v1535_v49 = vpop.eup %1534 }
 0xf23   :  { %1135 = vrot.lane.b32.xlu1 %v1535_v49, %s1594_s30  ;;  %v1537_v51 = vpop.eup %1536 }
 0xf24   :  { %v1095_v52 = vadd.f32 1.0, %v1537_v51 }
 0xf26   :  { %1538 = vrcp.f32 %v1095_v52  ;;  %v1108_v43 = vand.u32 2147483648, %v1095_v52  ;;  %vm1102_vm8 = vweird.f32 %v1095_v52  ;;  %v1106_v45 = vand.u32 2147483647, %v1095_v52 }
 0xf27   :  { %1540 = vpow2.f32 %v1399_v39 }
 0xf28   :  { %v1109_v42 = vor.u32 1.1754944e-38, %v1108_v43  ;;  %vm1107_vm10 = vcmp.eq.f32.partialorder %v1106_v45, 8.507059e+37 }
 0xf2c   :  { %v1539_v35 = vpop.eup %1538 }
 0xf2d   :  { %v1098_v36 = vmul.f32 %v1539_v35, %v1095_v52  ;;  %vm1103_vm7 = vweird.f32 %v1539_v35  ;;  %v1541_v46 = vpop.eup %1540 }
 0xf2e   :  { %vm1104_vm9 = vmor %vm1102_vm8, %vm1103_vm7  ;;  %v1096_v47 = vadd.f32 1.0, %v1541_v46  ;;  %vm1292_vm8 = vcmask 523264  }
 0xf2f   :  { %v1099_v37 = vsub.f32 1.0, %v1098_v36 }
 0xf30   :  { %1542 = vrcp.f32 %v1096_v47  ;;  %v1123_v10 = vand.u32 2147483648, %v1096_v47  ;;  %vm1117_vm12 = vweird.f32 %v1096_v47  ;;  %v1121_v62 = vand.u32 2147483647, %v1096_v47 }
 0xf31   :  { %v1100_v40 = vmul.f32 %v1539_v35, %v1099_v37 }
 0xf32   :  { %v1124_v11 = vor.u32 1.1754944e-38, %v1123_v10  ;;  %vm1122_vm14 = vcmp.eq.f32.partialorder %v1121_v62, 8.507059e+37 }
 0xf33   :  { %v1101_v41 = vadd.f32 %v1539_v35, %v1100_v40 }
 0xf35   :  { %v1105_v38 = vsel %vm1104_vm9, %v1539_v35, %v1101_v41  ;;  %vm1295_vm9 = vcmask 654336  }
 0xf36   :  { %v1110_v59 = vsel %vm1107_vm10, %v1109_v42, %v1105_v38  ;;  %v1543_v54 = vpop.eup %1542 }
 0xf37   :  { %v1113_v55 = vmul.f32 %v1543_v54, %v1096_v47  ;;  %vm1118_vm11 = vweird.f32 %v1543_v54  ;;  %v1129_v2 = vmul.f32 %v1110_v59, %v2048_v16 }
 0xf38   :  { %vm1119_vm13 = vmor %vm1117_vm12, %vm1118_vm11 }
 0xf39   :  { %v1114_v60 = vsub.f32 1.0, %v1113_v55 }
 0xf3b   :  { %v1115_v61 = vmul.f32 %v1543_v54, %v1114_v60 }
 0xf3d   :  { %v1116_v9 = vadd.f32 %v1543_v54, %v1115_v61 }
 0xf3f   :  { %v1120_v63 = vsel %vm1119_vm13, %v1543_v54, %v1116_v9 }
 0xf40   :  { %v1125_v1 = vsel %vm1122_vm14, %v1124_v11, %v1120_v63 }
 0xf41   :  { %v1130_v7 = vmul.f32 %v1125_v1, %v2053_v20 }
 0xf75   :  { %v1134_v48 = vpop.permute.xlu0 %1133 }
 0xf76   :  { %v1139_v53 = vmul.f32 %v1134_v48, %v1110_v59 }
 0xf78   :  { %1143 = vrot.lane.b32.xlu2 %v1139_v53, %s1595_s12 }
 0xf95   :  { %v1136_v0 = vpop.permute.xlu1 %1135 }
 0xf96   :  { %v1140_v12 = vmul.f32 %v1136_v0, %v1125_v1 }
 0xf98   :  { %1145 = vrot.lane.b32.xlu0 %v1140_v12, %s1595_s12 }
 0xfd2   :  { %v1144_v3 = vpop.permute.xlu2 %1143 }
 0xfd3   :  { %v2068_v4 = vadd.f32 %v1144_v3, %v1129_v2  ;;  %v1272_v2 = vld [vmem:[%s2123_s7] sm:$0xff] }
 0xfd5   :  { %1544 = vtanh.f32 %v2068_v4 }
 0xfdb   :  { %v1545_v6 = vpop.eup %1544 }
 0xfdc   :  { %1155 = vrot.lane.b32.xlu1 %v1545_v6, %s1594_s30  ;;  %v1273_v6 = vld [vmem:[%s2123_s7 + $0x8] sm:$0xff]  ;;  %s1596_s7 = smov [#allocation2]  }
0x100a   :  { %v1146_v8 = vpop.permute.xlu0 %1145 }
0x100b   :  { %v2073_v13 = vadd.f32 %v1146_v8, %v1130_v7 }
0x100d   :  { %1546 = vtanh.f32 %v2073_v13 }
0x1013   :  { %v1547_v58 = vpop.eup %1546 }
0x1014   :  { %1157 = vrot.lane.b32.xlu2 %v1547_v58, %s1594_s30 }
0x104e   :  { %v1156_v15 = vpop.permute.xlu1 %1155 }
0x104f   :  { %v1161_v16 = vmul.f32 %v1156_v15, %v1110_v59 }
0x1051   :  { %1165 = vrot.lane.b32.xlu0 %v1161_v16, %s1595_s12  ;;  %v1298_v16 = vld [vmem:[%s2124_s8] sm:$0xff] }
0x106e   :  { %v1158_v17 = vpop.permute.xlu2 %1157 }
0x106f   :  { %v1162_v44 = vmul.f32 %v1158_v17, %v1125_v1 }
0x1071   :  { %1167 = vrot.lane.b32.xlu1 %v1162_v44, %s1595_s12 }
0x10c3   :  { %v1166_v18 = vpop.permute.xlu0 %1165 }
0x10c4   :  { %1400 = vmatmul.msk.f32.vlgmr.msrb.gmra.mxu0 %vm289_vm4, %v1166_v18 }
0x10e3   :  { %v1168_v20 = vpop.permute.xlu1 %1167 }
0x10e4   :  { %1401 = vmatmul.msk.f32.gmra.mxu0 %vm289_vm4, %v1168_v20 }
0x1141   :  { %v1190_v24 = vpop.f32.mrf.mxu0 }
0x1142   :  { %v1196_v14 = vadd.f32 %v1190_v24, %v398_v22  ;;  %v1299_v22 = vld [vmem:[%s2124_s8 + $0x8] sm:$0xff] }
0x1144   :  { %1548 = vtanh.f32 %v1196_v14  ;;  %v1402_v30 = vmul.f32 -1.442695, %v1196_v14 }
0x114a   :  { %v1549_v26 = vpop.eup %1548 }
0x114b   :  { %1242 = vrot.lane.b32.xlu2 %v1549_v26, %s1594_s30 }
0x1161   :  { %v1193_v29 = vpop.f32.mrf.mxu0 }
0x1162   :  { %v1197_v19 = vadd.f32 %v1193_v29, %v401_v28 }
0x1164   :  { %1550 = vtanh.f32 %v1197_v19  ;;  %v1403_v40 = vmul.f32 -1.442695, %v1197_v19 }
0x1165   :  { %1552 = vpow2.f32 %v1402_v30 }
0x116a   :  { %v1551_v25 = vpop.eup %1550 }
0x116b   :  { %1244 = vrot.lane.b32.xlu0 %v1551_v25, %s1594_s30  ;;  %v1553_v31 = vpop.eup %1552 }
0x116c   :  { %v1204_v32 = vadd.f32 1.0, %v1553_v31 }
0x116e   :  { %1554 = vrcp.f32 %v1204_v32  ;;  %v1217_v51 = vand.u32 2147483648, %v1204_v32  ;;  %vm1211_vm0 = vweird.f32 %v1204_v32  ;;  %v1215_v23 = vand.u32 2147483647, %v1204_v32 }
0x116f   :  { %1556 = vpow2.f32 %v1403_v40 }
0x1170   :  { %v1218_v35 = vor.u32 1.1754944e-38, %v1217_v51  ;;  %vm1216_vm2 = vcmp.eq.f32.partialorder %v1215_v23, 8.507059e+37 }
0x1174   :  { %v1555_v5 = vpop.eup %1554 }
0x1175   :  { %v1207_v33 = vmul.f32 %v1555_v5, %v1204_v32  ;;  %vm1212_vm15 = vweird.f32 %v1555_v5  ;;  %v1557_v41 = vpop.eup %1556 }
0x1176   :  { %vm1213_vm1 = vmor %vm1211_vm0, %vm1212_vm15  ;;  %v1205_v43 = vadd.f32 1.0, %v1557_v41 }
0x1177   :  { %v1208_v34 = vsub.f32 1.0, %v1207_v33 }
0x1178   :  { %1558 = vrcp.f32 %v1205_v43  ;;  %v1232_v59 = vand.u32 2147483648, %v1205_v43  ;;  %vm1226_vm5 = vweird.f32 %v1205_v43  ;;  %v1230_v48 = vand.u32 2147483647, %v1205_v43 }
0x1179   :  { %v1209_v49 = vmul.f32 %v1555_v5, %v1208_v34 }
0x117a   :  { %v1233_v54 = vor.u32 1.1754944e-38, %v1232_v59  ;;  %vm1231_vm7 = vcmp.eq.f32.partialorder %v1230_v48, 8.507059e+37 }
0x117b   :  { %v1210_v50 = vadd.f32 %v1555_v5, %v1209_v49 }
0x117d   :  { %v1214_v52 = vsel %vm1213_vm1, %v1555_v5, %v1210_v50 }
0x117e   :  { %v1219_v37 = vsel %vm1216_vm2, %v1218_v35, %v1214_v52  ;;  %v1559_v45 = vpop.eup %1558 }
0x117f   :  { %v1222_v46 = vmul.f32 %v1559_v45, %v1205_v43  ;;  %vm1227_vm3 = vweird.f32 %v1559_v45  ;;  %v1238_v9 = vmul.f32 %v1219_v37, %v2068_v4 }
0x1180   :  { %vm1228_vm6 = vmor %vm1226_vm5, %vm1227_vm3 }
0x1181   :  { %v1223_v38 = vsub.f32 1.0, %v1222_v46 }
0x1183   :  { %v1224_v42 = vmul.f32 %v1559_v45, %v1223_v38 }
0x1185   :  { %v1225_v47 = vadd.f32 %v1559_v45, %v1224_v42 }
0x1187   :  { %v1229_v53 = vsel %vm1228_vm6, %v1559_v45, %v1225_v47 }
0x1188   :  { %v1234_v60 = vsel %vm1231_vm7, %v1233_v54, %v1229_v53 }
0x1189   :  { %v1239_v11 = vmul.f32 %v1234_v60, %v2073_v13 }
0x11a5   :  { %v1243_v36 = vpop.permute.xlu2 %1242 }
0x11a6   :  { %v1248_v39 = vmul.f32 %v1243_v36, %v1219_v37 }
0x11a8   :  { %1252 = vrot.lane.b32.xlu1 %v1248_v39, %s1595_s12 }
0x11dd   :  { %v1245_v55 = vpop.permute.xlu0 %1244 }
0x11de   :  { %v1249_v61 = vmul.f32 %v1245_v55, %v1234_v60 }
0x11e0   :  { %1254 = vrot.lane.b32.xlu2 %v1249_v61, %s1595_s12 }
0x121a   :  { %v1253_v10 = vpop.permute.xlu1 %1252 }
0x121b   :  { %v1258_v62 = vadd.f32 %v1253_v10, %v1238_v9 }
0x121d   :  { %1560 = vtanh.f32 %v1258_v62 }
0x1223   :  { %v1561_v63 = vpop.eup %1560 }
0x1224   :  { %1264 = vrot.lane.b32.xlu0 %v1561_v63, %s1594_s30 }
0x123a   :  { %v1255_v0 = vpop.permute.xlu2 %1254 }
0x123b   :  { %v1259_v1 = vadd.f32 %v1255_v0, %v1239_v11 }
0x123d   :  { %1562 = vtanh.f32 %v1259_v1 }
0x1243   :  { %v1563_v12 = vpop.eup %1562 }
0x1244   :  { %1266 = vrot.lane.b32.xlu1 %v1563_v12, %s1594_s30 }
0x124c   :  { %1284 = vrot.lane.b32.xlu1 %v1272_v2, %s1594_s30 }
0x1296   :  { %v1265_v3 = vpop.permute.xlu0 %1264 }
0x1297   :  { %v1270_v4 = vmul.f32 %v1265_v3, %v1219_v37 }
0x1299   :  { %1276 = vrot.lane.b32.xlu2 %v1270_v4, %s1594_s30 }
0x12a1   :  { %1286 = vrot.lane.b32.xlu2 %v1273_v6, %s1594_s30 }
0x12b6   :  { %v1267_v7 = vpop.permute.xlu1 %1266 }
0x12b7   :  { %v1271_v8 = vmul.f32 %v1267_v7, %v1234_v60 }
0x12b9   :  { %1278 = vrot.lane.b32.xlu0 %v1271_v8, %s1594_s30  ;;  %s1308_s30 = sshll.u32 %s1596_s7, 4  ;;  %s1309_s30 = int_to_ptr.vmem [resolvable:$true] %s1308_s30 }
0x12be   :  { %v1285_v13 = vpop.permute.xlu1 %1284 }
0x12f3   :  { %v1277_v58 = vpop.permute.xlu2 %1276 }
0x12f4   :  { %v1290_v15 = vsel %vm289_vm4, %v1820_v56, %v1277_v58 }
0x12f5   :  { %v1293_v17 = vsel %vm1292_vm8, %v1290_v15, %v1285_v13 }
0x12f6   :  { %v1296_v44 = vsel %vm1295_vm9, %v1293_v17, 0.0 }
0x12f7   :  { %v1300_v18 = vmul.f32 %v1298_v16, %v1296_v44 }
0x12f9   :  { %1302 = vst [vmem:[#allocation2] sm:$0xff] %v1300_v18 }
0x12fb   :  { %v1287_v20 = vpop.permute.xlu2 %1286 }
0x132b   :  { %v1279_v21 = vpop.permute.xlu0 %1278 }
0x132c   :  { %v1291_v56 = vsel %vm289_vm4, %v1822_v57, %v1279_v21 }
0x132d   :  { %v1294_v24 = vsel %vm1292_vm8, %v1291_v56, %v1287_v20 }
0x132e   :  { %v1297_v14 = vsel %vm1295_vm9, %v1294_v24, 0.0 }
0x132f   :  { %v1301_v26 = vmul.f32 %v1299_v22, %v1297_v14 }
0x1331   :  { %1303 = vst [vmem:[#allocation2 + $0x8] sm:$0xff] %v1301_v26 }
0x1332   :  { %1316 = dma.vmem_to_hbm [thread:$0]  %s1309_s30, 256, %s1311_s17, [#allocation3], %s1597_s20, %s1597_s20, %s1598_s21  }
0x1333   :  { %1589 = dma.done.wait [#allocation3], 256  }
0x1334   :  { %1590 = vsyncadd [#allocation3], 4294967040 }
0x1335   :  { %1321 = vsyncpa [#allocation3], 1 }

</bundles_post_ra>
